<compile_context>
chip_gen: v7x
topology: tpu7x:2x2x1
jax: 0.10.0
libtpu: 0.0.40
codegen_flags: <defaults>
</compile_context>

<pallas_src>
import functools
import math

import jax
import jax.numpy as jnp
from jax.experimental import pallas as pl


# ------------------------------ fused model kernel ------------------------------
def _make_bilstm_kernel(treedef, S, B, H, num_layer):
    """Build the fused kernel. S: seq len, B: padded batch, H: hidden size."""

    def input_proj(stream, w_part_refs, b_ref):
        # stream: list of (S*B, F_i) values; w_part_refs: matching (F_i, 4H) refs.
        # Returns (S*B, 4H): x-part of the gate pre-activations for all timesteps
        # (bias b_ih + b_hh already folded in).  One MXU pass per stream.
        acc = b_ref[...]                                        # (1, 4H), broadcasts
        for s, w_ref in zip(stream, w_part_refs):
            acc = acc + jnp.dot(s, w_ref[...], preferred_element_type=jnp.float32)
        return acc

    def run_direction(xw, whh_ref, h0, c0, reverse):
        # xw: (S*B, 4H); rows [t*B:(t+1)*B] belong to timestep t.
        whh = whh_ref[...]                                      # (H, 4H)
        h, c = h0, c0
        outs = [None] * S
        order = range(S - 1, -1, -1) if reverse else range(S)
        for t in order:                                          # unrolled (static S)
            gates = xw[t * B:(t + 1) * B, :] + jnp.dot(
                h, whh, preferred_element_type=jnp.float32)      # (B, 4H), i|f|g|o
            i = jax.nn.sigmoid(gates[:, 0 * H:1 * H])
            f = jax.nn.sigmoid(gates[:, 1 * H:2 * H])
            g = jnp.tanh(gates[:, 2 * H:3 * H])
            o = jax.nn.sigmoid(gates[:, 3 * H:4 * H])
            c = f * c + i * g
            h = o * jnp.tanh(c)
            outs[t] = h
        return outs

    def kernel(*refs):
        out_ref = refs[-1]
        p = jax.tree_util.tree_unflatten(treedef, refs[:-1])
        h0_ref, c0_ref = p["h0"], p["c0"]

        stream = [p["x"][...]]                                   # layer-0 input (S*B, In0)
        for l, lp in enumerate(p["layers"]):
            xw_f = input_proj(stream, lp["wih_f"], lp["b_f"])
            xw_b = input_proj(stream, lp["wih_b"], lp["b_b"])
            outs_f = run_direction(xw_f, lp["whh_f"],
                                   h0_ref[2 * l], c0_ref[2 * l], reverse=False)
            outs_b = run_direction(xw_b, lp["whh_b"],
                                   h0_ref[2 * l + 1], c0_ref[2 * l + 1], reverse=True)
            if l == num_layer - 1:
                # outputs[-1] = [h_f after the last step, h_b after its first step];
                # fuse the Linear here instead of writing (S, B, 2H) to HBM.
                out = (jnp.dot(outs_f[S - 1], p["fc_w_f"][...],
                               preferred_element_type=jnp.float32)
                       + jnp.dot(outs_b[S - 1], p["fc_w_b"][...],
                                 preferred_element_type=jnp.float32)
                       + p["fc_b"][...])
                out_ref[...] = out.astype(out_ref.dtype)
            else:
                # Next layer consumes concat([fwd, bwd]); we keep the two halves
                # as separate streams (its W_ih rows are pre-split), no concat
                # along the feature axis is ever materialized.
                stream = [jnp.concatenate(outs_f, axis=0),       # (S*B, H)
                          jnp.concatenate(outs_b, axis=0)]       # (S*B, H)

    return kernel


# ------------------------------ forward (wrapper) ------------------------------
def bilstm_forward(params, x_bsf, h0, c0, *, num_layer, hidden_size):
    """x_bsf: (batch, seq, num_classes) -> (batch, num_classes).

    Matches the PyTorch module: x = input.transpose(0, 1);
    outputs, _ = lstm(x, (h0, c0)); return fc(outputs[-1]).
    """
    B, S, In0 = x_bsf.shape
    H = hidden_size
    C = params["fc_b"].shape[-1]

    B_pad = max(8, -(-B // 8) * 8)                  # pad batch to a sublane multiple
    x = jnp.transpose(x_bsf, (1, 0, 2))             # time-major (S, B, In0)
    x = jnp.pad(x, ((0, 0), (0, B_pad - B), (0, 0))).reshape(S * B_pad, In0)
    h0p = jnp.pad(h0, ((0, 0), (0, B_pad - B), (0, 0)))
    c0p = jnp.pad(c0, ((0, 0), (0, B_pad - B), (0, 0)))

    inputs = {
        "x": x, "h0": h0p, "c0": c0p,
        "layers": params["layers"],
        "fc_w_f": params["fc_w_f"], "fc_w_b": params["fc_w_b"], "fc_b": params["fc_b"],
    }
    flat, treedef = jax.tree_util.tree_flatten(inputs)
    kernel = _make_bilstm_kernel(treedef, S, B_pad, H, num_layer)

    out = pl.pallas_call(
        kernel,
        out_shape=jax.ShapeDtypeStruct((B_pad, C), jnp.float32),
    )(*flat)
    return out[:B]


# ------------------------------ deterministic params ------------------------------
def init_params(key, num_classes, hidden_size, num_layer):
    H = hidden_size
    bound = 1.0 / math.sqrt(H)

    def u(rng, shape):
        return jax.random.uniform(rng, shape, jnp.float32, -bound, bound)

    layers = []
    for layer in range(num_layer):
        in_sz = num_classes if layer == 0 else 2 * H
        keys = jax.random.split(jax.random.fold_in(key, layer), 8)
        # PyTorch shapes: weight_ih (4H, in), weight_hh (4H, H), biases (4H,)
        wih_f = u(keys[0], (4 * H, in_sz)).T                        # (in, 4H)
        whh_f = u(keys[1], (4 * H, H)).T                            # (H, 4H)
        b_f = (u(keys[2], (4 * H,)) + u(keys[3], (4 * H,))).reshape(1, 4 * H)
        wih_b = u(keys[4], (4 * H, in_sz)).T
        whh_b = u(keys[5], (4 * H, H)).T
        b_b = (u(keys[6], (4 * H,)) + u(keys[7], (4 * H,))).reshape(1, 4 * H)
        if layer == 0:
            wih_f_parts, wih_b_parts = [wih_f], [wih_b]
        else:
            # Previous layer output is concat([fwd, bwd], -1): split the W_ih rows
            # so the kernel never has to materialize the concat.
            wih_f_parts = [wih_f[:H], wih_f[H:]]
            wih_b_parts = [wih_b[:H], wih_b[H:]]
        layers.append({
            "wih_f": wih_f_parts, "whh_f": whh_f, "b_f": b_f,
            "wih_b": wih_b_parts, "whh_b": whh_b, "b_b": b_b,
        })

    kf = jax.random.fold_in(key, 1000)
    kfw, kfb = jax.random.split(kf)
    fc_bound = 1.0 / math.sqrt(2 * H)
    fc_w_t = jax.random.uniform(
        kfw, (num_classes, 2 * H), jnp.float32, -fc_bound, fc_bound).T   # (2H, C)
    fc_b = jax.random.uniform(
        kfb, (num_classes,), jnp.float32, -fc_bound, fc_bound).reshape(1, num_classes)
    return {
        "layers": layers,
        "fc_w_f": fc_w_t[:H],        # (H, C): multiplies the forward half of outputs[-1]
        "fc_w_b": fc_w_t[H:],        # (H, C): multiplies the backward half
        "fc_b": fc_b,
    }


# ---------------------------------------- main ----------------------------------------
if __name__ == "__main__":
    # config (small, consistent with the module: LSTM(input=num_classes, hidden, bi))
    num_classes = 8
    hidden_size = 32          # 4H = 128 -> lane-aligned gate tile
    num_layer = 2             # exercises both the stacked-layer and the fc paths
    batch = 2
    seq = 8

    key = jax.random.PRNGKey(0)
    k_x, k_p, k_h, k_c = jax.random.split(key, 4)

    x = jax.random.normal(k_x, (batch, seq, num_classes), jnp.float32)
    params = init_params(k_p, num_classes, hidden_size, num_layer)

    # Reference uses torch.randn for initial states; deterministic JAX normals here.
    h0 = jax.random.normal(k_h, (2 * num_layer, batch, hidden_size), jnp.float32)
    c0 = jax.random.normal(k_c, (2 * num_layer, batch, hidden_size), jnp.float32)

    fwd = jax.jit(functools.partial(
        bilstm_forward, num_layer=num_layer, hidden_size=hidden_size))
    out = jax.block_until_ready(fwd(params, x, h0, c0))

    assert out.shape == (batch, num_classes), out.shape
    assert out.dtype == jnp.float32
    assert bool(jnp.all(jnp.isfinite(out)))
    print("KERNEL_OK")
</pallas_src>

<mosaic_0001>
module attributes {stable_mosaic.version = 11 : i64} {
  func.func @kernel(%arg0: memref<4x8x32xf32, #tpu.memory_space<vmem>>, %arg1: memref<1x8xf32, #tpu.memory_space<vmem>>, %arg2: memref<32x8xf32, #tpu.memory_space<vmem>>, %arg3: memref<32x8xf32, #tpu.memory_space<vmem>>, %arg4: memref<4x8x32xf32, #tpu.memory_space<vmem>>, %arg5: memref<1x128xf32, #tpu.memory_space<vmem>>, %arg6: memref<1x128xf32, #tpu.memory_space<vmem>>, %arg7: memref<32x128xf32, #tpu.memory_space<vmem>>, %arg8: memref<32x128xf32, #tpu.memory_space<vmem>>, %arg9: memref<8x128xf32, #tpu.memory_space<vmem>>, %arg10: memref<8x128xf32, #tpu.memory_space<vmem>>, %arg11: memref<1x128xf32, #tpu.memory_space<vmem>>, %arg12: memref<1x128xf32, #tpu.memory_space<vmem>>, %arg13: memref<32x128xf32, #tpu.memory_space<vmem>>, %arg14: memref<32x128xf32, #tpu.memory_space<vmem>>, %arg15: memref<32x128xf32, #tpu.memory_space<vmem>>, %arg16: memref<32x128xf32, #tpu.memory_space<vmem>>, %arg17: memref<32x128xf32, #tpu.memory_space<vmem>>, %arg18: memref<32x128xf32, #tpu.memory_space<vmem>>, %arg19: memref<64x8xf32, #tpu.memory_space<vmem>>, %arg20: memref<8x8xf32, #tpu.memory_space<vmem>>) attributes {dimension_semantics = [], scalar_prefetch = 0 : i64, scratch_operands = 0 : i64, tpu.core_type = #tpu.core_type<tc>} {
    %c0 = arith.constant 0 : index
    %c0_0 = arith.constant 0 : index
    %0 = vector.load %arg19[%c0, %c0_0] : memref<64x8xf32, #tpu.memory_space<vmem>>, vector<64x8xf32>
    %c0_1 = arith.constant 0 : index
    %c0_2 = arith.constant 0 : index
    %1 = vector.load %arg6[%c0_1, %c0_2] : memref<1x128xf32, #tpu.memory_space<vmem>>, vector<1x128xf32>
    %c0_3 = arith.constant 0 : index
    %c0_4 = arith.constant 0 : index
    %2 = vector.load %arg10[%c0_3, %c0_4] : memref<8x128xf32, #tpu.memory_space<vmem>>, vector<8x128xf32>
    %cst = arith.constant dense<0.000000e+00> : vector<64x128xf32>
    %3 = tpu.matmul %0, %2, %cst {dimension_numbers = #tpu.dot_dimension_numbers<[1], [0], [0], [1], [0, 0, 1, 1], [], []>} : vector<64x8xf32>, vector<8x128xf32>, vector<64x128xf32> -> vector<64x128xf32>
    %4 = vector.broadcast %1 : vector<1x128xf32> to vector<64x128xf32>
    %5 = arith.addf %4, %3 : vector<64x128xf32>
    %c0_5 = arith.constant 0 : index
    %c0_6 = arith.constant 0 : index
    %6 = vector.load %arg5[%c0_5, %c0_6] : memref<1x128xf32, #tpu.memory_space<vmem>>, vector<1x128xf32>
    %c0_7 = arith.constant 0 : index
    %c0_8 = arith.constant 0 : index
    %7 = vector.load %arg9[%c0_7, %c0_8] : memref<8x128xf32, #tpu.memory_space<vmem>>, vector<8x128xf32>
    %cst_9 = arith.constant dense<0.000000e+00> : vector<64x128xf32>
    %8 = tpu.matmul %0, %7, %cst_9 {dimension_numbers = #tpu.dot_dimension_numbers<[1], [0], [0], [1], [0, 0, 1, 1], [], []>} : vector<64x8xf32>, vector<8x128xf32>, vector<64x128xf32> -> vector<64x128xf32>
    %9 = vector.broadcast %6 : vector<1x128xf32> to vector<64x128xf32>
    %10 = arith.addf %9, %8 : vector<64x128xf32>
    %c0_10 = arith.constant 0 : index
    %c0_11 = arith.constant 0 : index
    %c0_12 = arith.constant 0 : index
    %11 = vector.load %arg4[%c0_10, %c0_11, %c0_12] : memref<4x8x32xf32, #tpu.memory_space<vmem>>, vector<1x8x32xf32>
    %12 = vector.shape_cast %11 : vector<1x8x32xf32> to vector<8x32xf32>
    %c0_13 = arith.constant 0 : index
    %c0_14 = arith.constant 0 : index
    %c0_15 = arith.constant 0 : index
    %13 = vector.load %arg0[%c0_13, %c0_14, %c0_15] : memref<4x8x32xf32, #tpu.memory_space<vmem>>, vector<1x8x32xf32>
    %14 = vector.shape_cast %13 : vector<1x8x32xf32> to vector<8x32xf32>
    %c0_16 = arith.constant 0 : index
    %c0_17 = arith.constant 0 : index
    %15 = vector.load %arg8[%c0_16, %c0_17] : memref<32x128xf32, #tpu.memory_space<vmem>>, vector<32x128xf32>
    %16 = vector.extract_strided_slice %5 {offsets = [0, 0], sizes = [8, 128], strides = [1, 1]} : vector<64x128xf32> to vector<8x128xf32>
    %cst_18 = arith.constant dense<0.000000e+00> : vector<8x128xf32>
    %17 = tpu.matmul %12, %15, %cst_18 {dimension_numbers = #tpu.dot_dimension_numbers<[1], [0], [0], [1], [0, 0, 1, 1], [], []>} : vector<8x32xf32>, vector<32x128xf32>, vector<8x128xf32> -> vector<8x128xf32>
    %18 = arith.addf %16, %17 : vector<8x128xf32>
    %19 = vector.extract_strided_slice %18 {offsets = [0, 0], sizes = [8, 32], strides = [1, 1]} : vector<8x128xf32> to vector<8x32xf32>
    %20 = arith.negf %19 : vector<8x32xf32>
    %21 = math.exp %20 : vector<8x32xf32>
    %cst_19 = arith.constant 1.000000e+00 : f32
    %22 = vector.broadcast %cst_19 : f32 to vector<8x32xf32>
    %23 = arith.addf %22, %21 : vector<8x32xf32>
    %24 = arith.divf %22, %23 : vector<8x32xf32>
    %25 = vector.extract_strided_slice %18 {offsets = [0, 32], sizes = [8, 32], strides = [1, 1]} : vector<8x128xf32> to vector<8x32xf32>
    %26 = arith.negf %25 : vector<8x32xf32>
    %27 = math.exp %26 : vector<8x32xf32>
    %cst_20 = arith.constant 1.000000e+00 : f32
    %28 = vector.broadcast %cst_20 : f32 to vector<8x32xf32>
    %29 = arith.addf %28, %27 : vector<8x32xf32>
    %30 = arith.divf %28, %29 : vector<8x32xf32>
    %31 = vector.extract_strided_slice %18 {offsets = [0, 64], sizes = [8, 32], strides = [1, 1]} : vector<8x128xf32> to vector<8x32xf32>
    %32 = math.tanh %31 : vector<8x32xf32>
    %33 = vector.extract_strided_slice %18 {offsets = [0, 96], sizes = [8, 32], strides = [1, 1]} : vector<8x128xf32> to vector<8x32xf32>
    %34 = arith.negf %33 : vector<8x32xf32>
    %35 = math.exp %34 : vector<8x32xf32>
    %cst_21 = arith.constant 1.000000e+00 : f32
    %36 = vector.broadcast %cst_21 : f32 to vector<8x32xf32>
    %37 = arith.addf %36, %35 : vector<8x32xf32>
    %38 = arith.divf %36, %37 : vector<8x32xf32>
    %39 = arith.mulf %30, %14 : vector<8x32xf32>
    %40 = arith.mulf %24, %32 : vector<8x32xf32>
    %41 = arith.addf %39, %40 : vector<8x32xf32>
    %42 = math.tanh %41 : vector<8x32xf32>
    %43 = arith.mulf %38, %42 : vector<8x32xf32>
    %44 = vector.extract_strided_slice %5 {offsets = [8, 0], sizes = [8, 128], strides = [1, 1]} : vector<64x128xf32> to vector<8x128xf32>
    %cst_22 = arith.constant dense<0.000000e+00> : vector<8x128xf32>
    %45 = tpu.matmul %43, %15, %cst_22 {dimension_numbers = #tpu.dot_dimension_numbers<[1], [0], [0], [1], [0, 0, 1, 1], [], []>} : vector<8x32xf32>, vector<32x128xf32>, vector<8x128xf32> -> vector<8x128xf32>
    %46 = arith.addf %44, %45 : vector<8x128xf32>
    %47 = vector.extract_strided_slice %46 {offsets = [0, 0], sizes = [8, 32], strides = [1, 1]} : vector<8x128xf32> to vector<8x32xf32>
    %48 = arith.negf %47 : vector<8x32xf32>
    %49 = math.exp %48 : vector<8x32xf32>
    %cst_23 = arith.constant 1.000000e+00 : f32
    %50 = vector.broadcast %cst_23 : f32 to vector<8x32xf32>
    %51 = arith.addf %50, %49 : vector<8x32xf32>
    %52 = arith.divf %50, %51 : vector<8x32xf32>
    %53 = vector.extract_strided_slice %46 {offsets = [0, 32], sizes = [8, 32], strides = [1, 1]} : vector<8x128xf32> to vector<8x32xf32>
    %54 = arith.negf %53 : vector<8x32xf32>
    %55 = math.exp %54 : vector<8x32xf32>
    %cst_24 = arith.constant 1.000000e+00 : f32
    %56 = vector.broadcast %cst_24 : f32 to vector<8x32xf32>
    %57 = arith.addf %56, %55 : vector<8x32xf32>
    %58 = arith.divf %56, %57 : vector<8x32xf32>
    %59 = vector.extract_strided_slice %46 {offsets = [0, 64], sizes = [8, 32], strides = [1, 1]} : vector<8x128xf32> to vector<8x32xf32>
    %60 = math.tanh %59 : vector<8x32xf32>
    %61 = vector.extract_strided_slice %46 {offsets = [0, 96], sizes = [8, 32], strides = [1, 1]} : vector<8x128xf32> to vector<8x32xf32>
    %62 = arith.negf %61 : vector<8x32xf32>
    %63 = math.exp %62 : vector<8x32xf32>
    %cst_25 = arith.constant 1.000000e+00 : f32
    %64 = vector.broadcast %cst_25 : f32 to vector<8x32xf32>
    %65 = arith.addf %64, %63 : vector<8x32xf32>
    %66 = arith.divf %64, %65 : vector<8x32xf32>
    %67 = arith.mulf %58, %41 : vector<8x32xf32>
    %68 = arith.mulf %52, %60 : vector<8x32xf32>
    %69 = arith.addf %67, %68 : vector<8x32xf32>
    %70 = math.tanh %69 : vector<8x32xf32>
    %71 = arith.mulf %66, %70 : vector<8x32xf32>
    %72 = vector.extract_strided_slice %5 {offsets = [16, 0], sizes = [8, 128], strides = [1, 1]} : vector<64x128xf32> to vector<8x128xf32>
    %cst_26 = arith.constant dense<0.000000e+00> : vector<8x128xf32>
    %73 = tpu.matmul %71, %15, %cst_26 {dimension_numbers = #tpu.dot_dimension_numbers<[1], [0], [0], [1], [0, 0, 1, 1], [], []>} : vector<8x32xf32>, vector<32x128xf32>, vector<8x128xf32> -> vector<8x128xf32>
    %74 = arith.addf %72, %73 : vector<8x128xf32>
    %75 = vector.extract_strided_slice %74 {offsets = [0, 0], sizes = [8, 32], strides = [1, 1]} : vector<8x128xf32> to vector<8x32xf32>
    %76 = arith.negf %75 : vector<8x32xf32>
    %77 = math.exp %76 : vector<8x32xf32>
    %cst_27 = arith.constant 1.000000e+00 : f32
    %78 = vector.broadcast %cst_27 : f32 to vector<8x32xf32>
    %79 = arith.addf %78, %77 : vector<8x32xf32>
    %80 = arith.divf %78, %79 : vector<8x32xf32>
    %81 = vector.extract_strided_slice %74 {offsets = [0, 32], sizes = [8, 32], strides = [1, 1]} : vector<8x128xf32> to vector<8x32xf32>
    %82 = arith.negf %81 : vector<8x32xf32>
    %83 = math.exp %82 : vector<8x32xf32>
    %cst_28 = arith.constant 1.000000e+00 : f32
    %84 = vector.broadcast %cst_28 : f32 to vector<8x32xf32>
    %85 = arith.addf %84, %83 : vector<8x32xf32>
    %86 = arith.divf %84, %85 : vector<8x32xf32>
    %87 = vector.extract_strided_slice %74 {offsets = [0, 64], sizes = [8, 32], strides = [1, 1]} : vector<8x128xf32> to vector<8x32xf32>
    %88 = math.tanh %87 : vector<8x32xf32>
    %89 = vector.extract_strided_slice %74 {offsets = [0, 96], sizes = [8, 32], strides = [1, 1]} : vector<8x128xf32> to vector<8x32xf32>
    %90 = arith.negf %89 : vector<8x32xf32>
    %91 = math.exp %90 : vector<8x32xf32>
    %cst_29 = arith.constant 1.000000e+00 : f32
    %92 = vector.broadcast %cst_29 : f32 to vector<8x32xf32>
    %93 = arith.addf %92, %91 : vector<8x32xf32>
    %94 = arith.divf %92, %93 : vector<8x32xf32>
    %95 = arith.mulf %86, %69 : vector<8x32xf32>
    %96 = arith.mulf %80, %88 : vector<8x32xf32>
    %97 = arith.addf %95, %96 : vector<8x32xf32>
    %98 = math.tanh %97 : vector<8x32xf32>
    %99 = arith.mulf %94, %98 : vector<8x32xf32>
    %100 = vector.extract_strided_slice %5 {offsets = [24, 0], sizes = [8, 128], strides = [1, 1]} : vector<64x128xf32> to vector<8x128xf32>
    %cst_30 = arith.constant dense<0.000000e+00> : vector<8x128xf32>
    %101 = tpu.matmul %99, %15, %cst_30 {dimension_numbers = #tpu.dot_dimension_numbers<[1], [0], [0], [1], [0, 0, 1, 1], [], []>} : vector<8x32xf32>, vector<32x128xf32>, vector<8x128xf32> -> vector<8x128xf32>
    %102 = arith.addf %100, %101 : vector<8x128xf32>
    %103 = vector.extract_strided_slice %102 {offsets = [0, 0], sizes = [8, 32], strides = [1, 1]} : vector<8x128xf32> to vector<8x32xf32>
    %104 = arith.negf %103 : vector<8x32xf32>
    %105 = math.exp %104 : vector<8x32xf32>
    %cst_31 = arith.constant 1.000000e+00 : f32
    %106 = vector.broadcast %cst_31 : f32 to vector<8x32xf32>
    %107 = arith.addf %106, %105 : vector<8x32xf32>
    %108 = arith.divf %106, %107 : vector<8x32xf32>
    %109 = vector.extract_strided_slice %102 {offsets = [0, 32], sizes = [8, 32], strides = [1, 1]} : vector<8x128xf32> to vector<8x32xf32>
    %110 = arith.negf %109 : vector<8x32xf32>
    %111 = math.exp %110 : vector<8x32xf32>
    %cst_32 = arith.constant 1.000000e+00 : f32
    %112 = vector.broadcast %cst_32 : f32 to vector<8x32xf32>
    %113 = arith.addf %112, %111 : vector<8x32xf32>
    %114 = arith.divf %112, %113 : vector<8x32xf32>
    %115 = vector.extract_strided_slice %102 {offsets = [0, 64], sizes = [8, 32], strides = [1, 1]} : vector<8x128xf32> to vector<8x32xf32>
    %116 = math.tanh %115 : vector<8x32xf32>
    %117 = vector.extract_strided_slice %102 {offsets = [0, 96], sizes = [8, 32], strides = [1, 1]} : vector<8x128xf32> to vector<8x32xf32>
    %118 = arith.negf %117 : vector<8x32xf32>
    %119 = math.exp %118 : vector<8x32xf32>
    %cst_33 = arith.constant 1.000000e+00 : f32
    %120 = vector.broadcast %cst_33 : f32 to vector<8x32xf32>
    %121 = arith.addf %120, %119 : vector<8x32xf32>
    %122 = arith.divf %120, %121 : vector<8x32xf32>
    %123 = arith.mulf %114, %97 : vector<8x32xf32>
    %124 = arith.mulf %108, %116 : vector<8x32xf32>
    %125 = arith.addf %123, %124 : vector<8x32xf32>
    %126 = math.tanh %125 : vector<8x32xf32>
    %127 = arith.mulf %122, %126 : vector<8x32xf32>
    %128 = vector.extract_strided_slice %5 {offsets = [32, 0], sizes = [8, 128], strides = [1, 1]} : vector<64x128xf32> to vector<8x128xf32>
    %cst_34 = arith.constant dense<0.000000e+00> : vector<8x128xf32>
    %129 = tpu.matmul %127, %15, %cst_34 {dimension_numbers = #tpu.dot_dimension_numbers<[1], [0], [0], [1], [0, 0, 1, 1], [], []>} : vector<8x32xf32>, vector<32x128xf32>, vector<8x128xf32> -> vector<8x128xf32>
    %130 = arith.addf %128, %129 : vector<8x128xf32>
    %131 = vector.extract_strided_slice %130 {offsets = [0, 0], sizes = [8, 32], strides = [1, 1]} : vector<8x128xf32> to vector<8x32xf32>
    %132 = arith.negf %131 : vector<8x32xf32>
    %133 = math.exp %132 : vector<8x32xf32>
    %cst_35 = arith.constant 1.000000e+00 : f32
    %134 = vector.broadcast %cst_35 : f32 to vector<8x32xf32>
    %135 = arith.addf %134, %133 : vector<8x32xf32>
    %136 = arith.divf %134, %135 : vector<8x32xf32>
    %137 = vector.extract_strided_slice %130 {offsets = [0, 32], sizes = [8, 32], strides = [1, 1]} : vector<8x128xf32> to vector<8x32xf32>
    %138 = arith.negf %137 : vector<8x32xf32>
    %139 = math.exp %138 : vector<8x32xf32>
    %cst_36 = arith.constant 1.000000e+00 : f32
    %140 = vector.broadcast %cst_36 : f32 to vector<8x32xf32>
    %141 = arith.addf %140, %139 : vector<8x32xf32>
    %142 = arith.divf %140, %141 : vector<8x32xf32>
    %143 = vector.extract_strided_slice %130 {offsets = [0, 64], sizes = [8, 32], strides = [1, 1]} : vector<8x128xf32> to vector<8x32xf32>
    %144 = math.tanh %143 : vector<8x32xf32>
    %145 = vector.extract_strided_slice %130 {offsets = [0, 96], sizes = [8, 32], strides = [1, 1]} : vector<8x128xf32> to vector<8x32xf32>
    %146 = arith.negf %145 : vector<8x32xf32>
    %147 = math.exp %146 : vector<8x32xf32>
    %cst_37 = arith.constant 1.000000e+00 : f32
    %148 = vector.broadcast %cst_37 : f32 to vector<8x32xf32>
    %149 = arith.addf %148, %147 : vector<8x32xf32>
    %150 = arith.divf %148, %149 : vector<8x32xf32>
    %151 = arith.mulf %142, %125 : vector<8x32xf32>
    %152 = arith.mulf %136, %144 : vector<8x32xf32>
    %153 = arith.addf %151, %152 : vector<8x32xf32>
    %154 = math.tanh %153 : vector<8x32xf32>
    %155 = arith.mulf %150, %154 : vector<8x32xf32>
    %156 = vector.extract_strided_slice %5 {offsets = [40, 0], sizes = [8, 128], strides = [1, 1]} : vector<64x128xf32> to vector<8x128xf32>
    %cst_38 = arith.constant dense<0.000000e+00> : vector<8x128xf32>
    %157 = tpu.matmul %155, %15, %cst_38 {dimension_numbers = #tpu.dot_dimension_numbers<[1], [0], [0], [1], [0, 0, 1, 1], [], []>} : vector<8x32xf32>, vector<32x128xf32>, vector<8x128xf32> -> vector<8x128xf32>
    %158 = arith.addf %156, %157 : vector<8x128xf32>
    %159 = vector.extract_strided_slice %158 {offsets = [0, 0], sizes = [8, 32], strides = [1, 1]} : vector<8x128xf32> to vector<8x32xf32>
    %160 = arith.negf %159 : vector<8x32xf32>
    %161 = math.exp %160 : vector<8x32xf32>
    %cst_39 = arith.constant 1.000000e+00 : f32
    %162 = vector.broadcast %cst_39 : f32 to vector<8x32xf32>
    %163 = arith.addf %162, %161 : vector<8x32xf32>
    %164 = arith.divf %162, %163 : vector<8x32xf32>
    %165 = vector.extract_strided_slice %158 {offsets = [0, 32], sizes = [8, 32], strides = [1, 1]} : vector<8x128xf32> to vector<8x32xf32>
    %166 = arith.negf %165 : vector<8x32xf32>
    %167 = math.exp %166 : vector<8x32xf32>
    %cst_40 = arith.constant 1.000000e+00 : f32
    %168 = vector.broadcast %cst_40 : f32 to vector<8x32xf32>
    %169 = arith.addf %168, %167 : vector<8x32xf32>
    %170 = arith.divf %168, %169 : vector<8x32xf32>
    %171 = vector.extract_strided_slice %158 {offsets = [0, 64], sizes = [8, 32], strides = [1, 1]} : vector<8x128xf32> to vector<8x32xf32>
    %172 = math.tanh %171 : vector<8x32xf32>
    %173 = vector.extract_strided_slice %158 {offsets = [0, 96], sizes = [8, 32], strides = [1, 1]} : vector<8x128xf32> to vector<8x32xf32>
    %174 = arith.negf %173 : vector<8x32xf32>
    %175 = math.exp %174 : vector<8x32xf32>
    %cst_41 = arith.constant 1.000000e+00 : f32
    %176 = vector.broadcast %cst_41 : f32 to vector<8x32xf32>
    %177 = arith.addf %176, %175 : vector<8x32xf32>
    %178 = arith.divf %176, %177 : vector<8x32xf32>
    %179 = arith.mulf %170, %153 : vector<8x32xf32>
    %180 = arith.mulf %164, %172 : vector<8x32xf32>
    %181 = arith.addf %179, %180 : vector<8x32xf32>
    %182 = math.tanh %181 : vector<8x32xf32>
    %183 = arith.mulf %178, %182 : vector<8x32xf32>
    %184 = vector.extract_strided_slice %5 {offsets = [48, 0], sizes = [8, 128], strides = [1, 1]} : vector<64x128xf32> to vector<8x128xf32>
    %cst_42 = arith.constant dense<0.000000e+00> : vector<8x128xf32>
    %185 = tpu.matmul %183, %15, %cst_42 {dimension_numbers = #tpu.dot_dimension_numbers<[1], [0], [0], [1], [0, 0, 1, 1], [], []>} : vector<8x32xf32>, vector<32x128xf32>, vector<8x128xf32> -> vector<8x128xf32>
    %186 = arith.addf %184, %185 : vector<8x128xf32>
    %187 = vector.extract_strided_slice %186 {offsets = [0, 0], sizes = [8, 32], strides = [1, 1]} : vector<8x128xf32> to vector<8x32xf32>
    %188 = arith.negf %187 : vector<8x32xf32>
    %189 = math.exp %188 : vector<8x32xf32>
    %cst_43 = arith.constant 1.000000e+00 : f32
    %190 = vector.broadcast %cst_43 : f32 to vector<8x32xf32>
    %191 = arith.addf %190, %189 : vector<8x32xf32>
    %192 = arith.divf %190, %191 : vector<8x32xf32>
    %193 = vector.extract_strided_slice %186 {offsets = [0, 32], sizes = [8, 32], strides = [1, 1]} : vector<8x128xf32> to vector<8x32xf32>
    %194 = arith.negf %193 : vector<8x32xf32>
    %195 = math.exp %194 : vector<8x32xf32>
    %cst_44 = arith.constant 1.000000e+00 : f32
    %196 = vector.broadcast %cst_44 : f32 to vector<8x32xf32>
    %197 = arith.addf %196, %195 : vector<8x32xf32>
    %198 = arith.divf %196, %197 : vector<8x32xf32>
    %199 = vector.extract_strided_slice %186 {offsets = [0, 64], sizes = [8, 32], strides = [1, 1]} : vector<8x128xf32> to vector<8x32xf32>
    %200 = math.tanh %199 : vector<8x32xf32>
    %201 = vector.extract_strided_slice %186 {offsets = [0, 96], sizes = [8, 32], strides = [1, 1]} : vector<8x128xf32> to vector<8x32xf32>
    %202 = arith.negf %201 : vector<8x32xf32>
    %203 = math.exp %202 : vector<8x32xf32>
    %cst_45 = arith.constant 1.000000e+00 : f32
    %204 = vector.broadcast %cst_45 : f32 to vector<8x32xf32>
    %205 = arith.addf %204, %203 : vector<8x32xf32>
    %206 = arith.divf %204, %205 : vector<8x32xf32>
    %207 = arith.mulf %198, %181 : vector<8x32xf32>
    %208 = arith.mulf %192, %200 : vector<8x32xf32>
    %209 = arith.addf %207, %208 : vector<8x32xf32>
    %210 = math.tanh %209 : vector<8x32xf32>
    %211 = arith.mulf %206, %210 : vector<8x32xf32>
    %212 = vector.extract_strided_slice %5 {offsets = [56, 0], sizes = [8, 128], strides = [1, 1]} : vector<64x128xf32> to vector<8x128xf32>
    %cst_46 = arith.constant dense<0.000000e+00> : vector<8x128xf32>
    %213 = tpu.matmul %211, %15, %cst_46 {dimension_numbers = #tpu.dot_dimension_numbers<[1], [0], [0], [1], [0, 0, 1, 1], [], []>} : vector<8x32xf32>, vector<32x128xf32>, vector<8x128xf32> -> vector<8x128xf32>
    %214 = arith.addf %212, %213 : vector<8x128xf32>
    %215 = vector.extract_strided_slice %214 {offsets = [0, 0], sizes = [8, 32], strides = [1, 1]} : vector<8x128xf32> to vector<8x32xf32>
    %216 = arith.negf %215 : vector<8x32xf32>
    %217 = math.exp %216 : vector<8x32xf32>
    %cst_47 = arith.constant 1.000000e+00 : f32
    %218 = vector.broadcast %cst_47 : f32 to vector<8x32xf32>
    %219 = arith.addf %218, %217 : vector<8x32xf32>
    %220 = arith.divf %218, %219 : vector<8x32xf32>
    %221 = vector.extract_strided_slice %214 {offsets = [0, 32], sizes = [8, 32], strides = [1, 1]} : vector<8x128xf32> to vector<8x32xf32>
    %222 = arith.negf %221 : vector<8x32xf32>
    %223 = math.exp %222 : vector<8x32xf32>
    %cst_48 = arith.constant 1.000000e+00 : f32
    %224 = vector.broadcast %cst_48 : f32 to vector<8x32xf32>
    %225 = arith.addf %224, %223 : vector<8x32xf32>
    %226 = arith.divf %224, %225 : vector<8x32xf32>
    %227 = vector.extract_strided_slice %214 {offsets = [0, 64], sizes = [8, 32], strides = [1, 1]} : vector<8x128xf32> to vector<8x32xf32>
    %228 = math.tanh %227 : vector<8x32xf32>
    %229 = vector.extract_strided_slice %214 {offsets = [0, 96], sizes = [8, 32], strides = [1, 1]} : vector<8x128xf32> to vector<8x32xf32>
    %230 = arith.negf %229 : vector<8x32xf32>
    %231 = math.exp %230 : vector<8x32xf32>
    %cst_49 = arith.constant 1.000000e+00 : f32
    %232 = vector.broadcast %cst_49 : f32 to vector<8x32xf32>
    %233 = arith.addf %232, %231 : vector<8x32xf32>
    %234 = arith.divf %232, %233 : vector<8x32xf32>
    %235 = arith.mulf %226, %209 : vector<8x32xf32>
    %236 = arith.mulf %220, %228 : vector<8x32xf32>
    %237 = arith.addf %235, %236 : vector<8x32xf32>
    %238 = math.tanh %237 : vector<8x32xf32>
    %239 = arith.mulf %234, %238 : vector<8x32xf32>
    %c1 = arith.constant 1 : index
    %c0_50 = arith.constant 0 : index
    %c0_51 = arith.constant 0 : index
    %240 = vector.load %arg4[%c1, %c0_50, %c0_51] : memref<4x8x32xf32, #tpu.memory_space<vmem>>, vector<1x8x32xf32>
    %241 = vector.shape_cast %240 : vector<1x8x32xf32> to vector<8x32xf32>
    %c1_52 = arith.constant 1 : index
    %c0_53 = arith.constant 0 : index
    %c0_54 = arith.constant 0 : index
    %242 = vector.load %arg0[%c1_52, %c0_53, %c0_54] : memref<4x8x32xf32, #tpu.memory_space<vmem>>, vector<1x8x32xf32>
    %243 = vector.shape_cast %242 : vector<1x8x32xf32> to vector<8x32xf32>
    %c0_55 = arith.constant 0 : index
    %c0_56 = arith.constant 0 : index
    %244 = vector.load %arg7[%c0_55, %c0_56] : memref<32x128xf32, #tpu.memory_space<vmem>>, vector<32x128xf32>
    %245 = vector.extract_strided_slice %10 {offsets = [56, 0], sizes = [8, 128], strides = [1, 1]} : vector<64x128xf32> to vector<8x128xf32>
    %cst_57 = arith.constant dense<0.000000e+00> : vector<8x128xf32>
    %246 = tpu.matmul %241, %244, %cst_57 {dimension_numbers = #tpu.dot_dimension_numbers<[1], [0], [0], [1], [0, 0, 1, 1], [], []>} : vector<8x32xf32>, vector<32x128xf32>, vector<8x128xf32> -> vector<8x128xf32>
    %247 = arith.addf %245, %246 : vector<8x128xf32>
    %248 = vector.extract_strided_slice %247 {offsets = [0, 0], sizes = [8, 32], strides = [1, 1]} : vector<8x128xf32> to vector<8x32xf32>
    %249 = arith.negf %248 : vector<8x32xf32>
    %250 = math.exp %249 : vector<8x32xf32>
    %cst_58 = arith.constant 1.000000e+00 : f32
    %251 = vector.broadcast %cst_58 : f32 to vector<8x32xf32>
    %252 = arith.addf %251, %250 : vector<8x32xf32>
    %253 = arith.divf %251, %252 : vector<8x32xf32>
    %254 = vector.extract_strided_slice %247 {offsets = [0, 32], sizes = [8, 32], strides = [1, 1]} : vector<8x128xf32> to vector<8x32xf32>
    %255 = arith.negf %254 : vector<8x32xf32>
    %256 = math.exp %255 : vector<8x32xf32>
    %cst_59 = arith.constant 1.000000e+00 : f32
    %257 = vector.broadcast %cst_59 : f32 to vector<8x32xf32>
    %258 = arith.addf %257, %256 : vector<8x32xf32>
    %259 = arith.divf %257, %258 : vector<8x32xf32>
    %260 = vector.extract_strided_slice %247 {offsets = [0, 64], sizes = [8, 32], strides = [1, 1]} : vector<8x128xf32> to vector<8x32xf32>
    %261 = math.tanh %260 : vector<8x32xf32>
    %262 = vector.extract_strided_slice %247 {offsets = [0, 96], sizes = [8, 32], strides = [1, 1]} : vector<8x128xf32> to vector<8x32xf32>
    %263 = arith.negf %262 : vector<8x32xf32>
    %264 = math.exp %263 : vector<8x32xf32>
    %cst_60 = arith.constant 1.000000e+00 : f32
    %265 = vector.broadcast %cst_60 : f32 to vector<8x32xf32>
    %266 = arith.addf %265, %264 : vector<8x32xf32>
    %267 = arith.divf %265, %266 : vector<8x32xf32>
    %268 = arith.mulf %259, %243 : vector<8x32xf32>
    %269 = arith.mulf %253, %261 : vector<8x32xf32>
    %270 = arith.addf %268, %269 : vector<8x32xf32>
    %271 = math.tanh %270 : vector<8x32xf32>
    %272 = arith.mulf %267, %271 : vector<8x32xf32>
    %273 = vector.extract_strided_slice %10 {offsets = [48, 0], sizes = [8, 128], strides = [1, 1]} : vector<64x128xf32> to vector<8x128xf32>
    %cst_61 = arith.constant dense<0.000000e+00> : vector<8x128xf32>
    %274 = tpu.matmul %272, %244, %cst_61 {dimension_numbers = #tpu.dot_dimension_numbers<[1], [0], [0], [1], [0, 0, 1, 1], [], []>} : vector<8x32xf32>, vector<32x128xf32>, vector<8x128xf32> -> vector<8x128xf32>
    %275 = arith.addf %273, %274 : vector<8x128xf32>
    %276 = vector.extract_strided_slice %275 {offsets = [0, 0], sizes = [8, 32], strides = [1, 1]} : vector<8x128xf32> to vector<8x32xf32>
    %277 = arith.negf %276 : vector<8x32xf32>
    %278 = math.exp %277 : vector<8x32xf32>
    %cst_62 = arith.constant 1.000000e+00 : f32
    %279 = vector.broadcast %cst_62 : f32 to vector<8x32xf32>
    %280 = arith.addf %279, %278 : vector<8x32xf32>
    %281 = arith.divf %279, %280 : vector<8x32xf32>
    %282 = vector.extract_strided_slice %275 {offsets = [0, 32], sizes = [8, 32], strides = [1, 1]} : vector<8x128xf32> to vector<8x32xf32>
    %283 = arith.negf %282 : vector<8x32xf32>
    %284 = math.exp %283 : vector<8x32xf32>
    %cst_63 = arith.constant 1.000000e+00 : f32
    %285 = vector.broadcast %cst_63 : f32 to vector<8x32xf32>
    %286 = arith.addf %285, %284 : vector<8x32xf32>
    %287 = arith.divf %285, %286 : vector<8x32xf32>
    %288 = vector.extract_strided_slice %275 {offsets = [0, 64], sizes = [8, 32], strides = [1, 1]} : vector<8x128xf32> to vector<8x32xf32>
    %289 = math.tanh %288 : vector<8x32xf32>
    %290 = vector.extract_strided_slice %275 {offsets = [0, 96], sizes = [8, 32], strides = [1, 1]} : vector<8x128xf32> to vector<8x32xf32>
    %291 = arith.negf %290 : vector<8x32xf32>
    %292 = math.exp %291 : vector<8x32xf32>
    %cst_64 = arith.constant 1.000000e+00 : f32
    %293 = vector.broadcast %cst_64 : f32 to vector<8x32xf32>
    %294 = arith.addf %293, %292 : vector<8x32xf32>
    %295 = arith.divf %293, %294 : vector<8x32xf32>
    %296 = arith.mulf %287, %270 : vector<8x32xf32>
    %297 = arith.mulf %281, %289 : vector<8x32xf32>
    %298 = arith.addf %296, %297 : vector<8x32xf32>
    %299 = math.tanh %298 : vector<8x32xf32>
    %300 = arith.mulf %295, %299 : vector<8x32xf32>
    %301 = vector.extract_strided_slice %10 {offsets = [40, 0], sizes = [8, 128], strides = [1, 1]} : vector<64x128xf32> to vector<8x128xf32>
    %cst_65 = arith.constant dense<0.000000e+00> : vector<8x128xf32>
    %302 = tpu.matmul %300, %244, %cst_65 {dimension_numbers = #tpu.dot_dimension_numbers<[1], [0], [0], [1], [0, 0, 1, 1], [], []>} : vector<8x32xf32>, vector<32x128xf32>, vector<8x128xf32> -> vector<8x128xf32>
    %303 = arith.addf %301, %302 : vector<8x128xf32>
    %304 = vector.extract_strided_slice %303 {offsets = [0, 0], sizes = [8, 32], strides = [1, 1]} : vector<8x128xf32> to vector<8x32xf32>
    %305 = arith.negf %304 : vector<8x32xf32>
    %306 = math.exp %305 : vector<8x32xf32>
    %cst_66 = arith.constant 1.000000e+00 : f32
    %307 = vector.broadcast %cst_66 : f32 to vector<8x32xf32>
    %308 = arith.addf %307, %306 : vector<8x32xf32>
    %309 = arith.divf %307, %308 : vector<8x32xf32>
    %310 = vector.extract_strided_slice %303 {offsets = [0, 32], sizes = [8, 32], strides = [1, 1]} : vector<8x128xf32> to vector<8x32xf32>
    %311 = arith.negf %310 : vector<8x32xf32>
    %312 = math.exp %311 : vector<8x32xf32>
    %cst_67 = arith.constant 1.000000e+00 : f32
    %313 = vector.broadcast %cst_67 : f32 to vector<8x32xf32>
    %314 = arith.addf %313, %312 : vector<8x32xf32>
    %315 = arith.divf %313, %314 : vector<8x32xf32>
    %316 = vector.extract_strided_slice %303 {offsets = [0, 64], sizes = [8, 32], strides = [1, 1]} : vector<8x128xf32> to vector<8x32xf32>
    %317 = math.tanh %316 : vector<8x32xf32>
    %318 = vector.extract_strided_slice %303 {offsets = [0, 96], sizes = [8, 32], strides = [1, 1]} : vector<8x128xf32> to vector<8x32xf32>
    %319 = arith.negf %318 : vector<8x32xf32>
    %320 = math.exp %319 : vector<8x32xf32>
    %cst_68 = arith.constant 1.000000e+00 : f32
    %321 = vector.broadcast %cst_68 : f32 to vector<8x32xf32>
    %322 = arith.addf %321, %320 : vector<8x32xf32>
    %323 = arith.divf %321, %322 : vector<8x32xf32>
    %324 = arith.mulf %315, %298 : vector<8x32xf32>
    %325 = arith.mulf %309, %317 : vector<8x32xf32>
    %326 = arith.addf %324, %325 : vector<8x32xf32>
    %327 = math.tanh %326 : vector<8x32xf32>
    %328 = arith.mulf %323, %327 : vector<8x32xf32>
    %329 = vector.extract_strided_slice %10 {offsets = [32, 0], sizes = [8, 128], strides = [1, 1]} : vector<64x128xf32> to vector<8x128xf32>
    %cst_69 = arith.constant dense<0.000000e+00> : vector<8x128xf32>
    %330 = tpu.matmul %328, %244, %cst_69 {dimension_numbers = #tpu.dot_dimension_numbers<[1], [0], [0], [1], [0, 0, 1, 1], [], []>} : vector<8x32xf32>, vector<32x128xf32>, vector<8x128xf32> -> vector<8x128xf32>
    %331 = arith.addf %329, %330 : vector<8x128xf32>
    %332 = vector.extract_strided_slice %331 {offsets = [0, 0], sizes = [8, 32], strides = [1, 1]} : vector<8x128xf32> to vector<8x32xf32>
    %333 = arith.negf %332 : vector<8x32xf32>
    %334 = math.exp %333 : vector<8x32xf32>
    %cst_70 = arith.constant 1.000000e+00 : f32
    %335 = vector.broadcast %cst_70 : f32 to vector<8x32xf32>
    %336 = arith.addf %335, %334 : vector<8x32xf32>
    %337 = arith.divf %335, %336 : vector<8x32xf32>
    %338 = vector.extract_strided_slice %331 {offsets = [0, 32], sizes = [8, 32], strides = [1, 1]} : vector<8x128xf32> to vector<8x32xf32>
    %339 = arith.negf %338 : vector<8x32xf32>
    %340 = math.exp %339 : vector<8x32xf32>
    %cst_71 = arith.constant 1.000000e+00 : f32
    %341 = vector.broadcast %cst_71 : f32 to vector<8x32xf32>
    %342 = arith.addf %341, %340 : vector<8x32xf32>
    %343 = arith.divf %341, %342 : vector<8x32xf32>
    %344 = vector.extract_strided_slice %331 {offsets = [0, 64], sizes = [8, 32], strides = [1, 1]} : vector<8x128xf32> to vector<8x32xf32>
    %345 = math.tanh %344 : vector<8x32xf32>
    %346 = vector.extract_strided_slice %331 {offsets = [0, 96], sizes = [8, 32], strides = [1, 1]} : vector<8x128xf32> to vector<8x32xf32>
    %347 = arith.negf %346 : vector<8x32xf32>
    %348 = math.exp %347 : vector<8x32xf32>
    %cst_72 = arith.constant 1.000000e+00 : f32
    %349 = vector.broadcast %cst_72 : f32 to vector<8x32xf32>
    %350 = arith.addf %349, %348 : vector<8x32xf32>
    %351 = arith.divf %349, %350 : vector<8x32xf32>
    %352 = arith.mulf %343, %326 : vector<8x32xf32>
    %353 = arith.mulf %337, %345 : vector<8x32xf32>
    %354 = arith.addf %352, %353 : vector<8x32xf32>
    %355 = math.tanh %354 : vector<8x32xf32>
    %356 = arith.mulf %351, %355 : vector<8x32xf32>
    %357 = vector.extract_strided_slice %10 {offsets = [24, 0], sizes = [8, 128], strides = [1, 1]} : vector<64x128xf32> to vector<8x128xf32>
    %cst_73 = arith.constant dense<0.000000e+00> : vector<8x128xf32>
    %358 = tpu.matmul %356, %244, %cst_73 {dimension_numbers = #tpu.dot_dimension_numbers<[1], [0], [0], [1], [0, 0, 1, 1], [], []>} : vector<8x32xf32>, vector<32x128xf32>, vector<8x128xf32> -> vector<8x128xf32>
    %359 = arith.addf %357, %358 : vector<8x128xf32>
    %360 = vector.extract_strided_slice %359 {offsets = [0, 0], sizes = [8, 32], strides = [1, 1]} : vector<8x128xf32> to vector<8x32xf32>
    %361 = arith.negf %360 : vector<8x32xf32>
    %362 = math.exp %361 : vector<8x32xf32>
    %cst_74 = arith.constant 1.000000e+00 : f32
    %363 = vector.broadcast %cst_74 : f32 to vector<8x32xf32>
    %364 = arith.addf %363, %362 : vector<8x32xf32>
    %365 = arith.divf %363, %364 : vector<8x32xf32>
    %366 = vector.extract_strided_slice %359 {offsets = [0, 32], sizes = [8, 32], strides = [1, 1]} : vector<8x128xf32> to vector<8x32xf32>
    %367 = arith.negf %366 : vector<8x32xf32>
    %368 = math.exp %367 : vector<8x32xf32>
    %cst_75 = arith.constant 1.000000e+00 : f32
    %369 = vector.broadcast %cst_75 : f32 to vector<8x32xf32>
    %370 = arith.addf %369, %368 : vector<8x32xf32>
    %371 = arith.divf %369, %370 : vector<8x32xf32>
    %372 = vector.extract_strided_slice %359 {offsets = [0, 64], sizes = [8, 32], strides = [1, 1]} : vector<8x128xf32> to vector<8x32xf32>
    %373 = math.tanh %372 : vector<8x32xf32>
    %374 = vector.extract_strided_slice %359 {offsets = [0, 96], sizes = [8, 32], strides = [1, 1]} : vector<8x128xf32> to vector<8x32xf32>
    %375 = arith.negf %374 : vector<8x32xf32>
    %376 = math.exp %375 : vector<8x32xf32>
    %cst_76 = arith.constant 1.000000e+00 : f32
    %377 = vector.broadcast %cst_76 : f32 to vector<8x32xf32>
    %378 = arith.addf %377, %376 : vector<8x32xf32>
    %379 = arith.divf %377, %378 : vector<8x32xf32>
    %380 = arith.mulf %371, %354 : vector<8x32xf32>
    %381 = arith.mulf %365, %373 : vector<8x32xf32>
    %382 = arith.addf %380, %381 : vector<8x32xf32>
    %383 = math.tanh %382 : vector<8x32xf32>
    %384 = arith.mulf %379, %383 : vector<8x32xf32>
    %385 = vector.extract_strided_slice %10 {offsets = [16, 0], sizes = [8, 128], strides = [1, 1]} : vector<64x128xf32> to vector<8x128xf32>
    %cst_77 = arith.constant dense<0.000000e+00> : vector<8x128xf32>
    %386 = tpu.matmul %384, %244, %cst_77 {dimension_numbers = #tpu.dot_dimension_numbers<[1], [0], [0], [1], [0, 0, 1, 1], [], []>} : vector<8x32xf32>, vector<32x128xf32>, vector<8x128xf32> -> vector<8x128xf32>
    %387 = arith.addf %385, %386 : vector<8x128xf32>
    %388 = vector.extract_strided_slice %387 {offsets = [0, 0], sizes = [8, 32], strides = [1, 1]} : vector<8x128xf32> to vector<8x32xf32>
    %389 = arith.negf %388 : vector<8x32xf32>
    %390 = math.exp %389 : vector<8x32xf32>
    %cst_78 = arith.constant 1.000000e+00 : f32
    %391 = vector.broadcast %cst_78 : f32 to vector<8x32xf32>
    %392 = arith.addf %391, %390 : vector<8x32xf32>
    %393 = arith.divf %391, %392 : vector<8x32xf32>
    %394 = vector.extract_strided_slice %387 {offsets = [0, 32], sizes = [8, 32], strides = [1, 1]} : vector<8x128xf32> to vector<8x32xf32>
    %395 = arith.negf %394 : vector<8x32xf32>
    %396 = math.exp %395 : vector<8x32xf32>
    %cst_79 = arith.constant 1.000000e+00 : f32
    %397 = vector.broadcast %cst_79 : f32 to vector<8x32xf32>
    %398 = arith.addf %397, %396 : vector<8x32xf32>
    %399 = arith.divf %397, %398 : vector<8x32xf32>
    %400 = vector.extract_strided_slice %387 {offsets = [0, 64], sizes = [8, 32], strides = [1, 1]} : vector<8x128xf32> to vector<8x32xf32>
    %401 = math.tanh %400 : vector<8x32xf32>
    %402 = vector.extract_strided_slice %387 {offsets = [0, 96], sizes = [8, 32], strides = [1, 1]} : vector<8x128xf32> to vector<8x32xf32>
    %403 = arith.negf %402 : vector<8x32xf32>
    %404 = math.exp %403 : vector<8x32xf32>
    %cst_80 = arith.constant 1.000000e+00 : f32
    %405 = vector.broadcast %cst_80 : f32 to vector<8x32xf32>
    %406 = arith.addf %405, %404 : vector<8x32xf32>
    %407 = arith.divf %405, %406 : vector<8x32xf32>
    %408 = arith.mulf %399, %382 : vector<8x32xf32>
    %409 = arith.mulf %393, %401 : vector<8x32xf32>
    %410 = arith.addf %408, %409 : vector<8x32xf32>
    %411 = math.tanh %410 : vector<8x32xf32>
    %412 = arith.mulf %407, %411 : vector<8x32xf32>
    %413 = vector.extract_strided_slice %10 {offsets = [8, 0], sizes = [8, 128], strides = [1, 1]} : vector<64x128xf32> to vector<8x128xf32>
    %cst_81 = arith.constant dense<0.000000e+00> : vector<8x128xf32>
    %414 = tpu.matmul %412, %244, %cst_81 {dimension_numbers = #tpu.dot_dimension_numbers<[1], [0], [0], [1], [0, 0, 1, 1], [], []>} : vector<8x32xf32>, vector<32x128xf32>, vector<8x128xf32> -> vector<8x128xf32>
    %415 = arith.addf %413, %414 : vector<8x128xf32>
    %416 = vector.extract_strided_slice %415 {offsets = [0, 0], sizes = [8, 32], strides = [1, 1]} : vector<8x128xf32> to vector<8x32xf32>
    %417 = arith.negf %416 : vector<8x32xf32>
    %418 = math.exp %417 : vector<8x32xf32>
    %cst_82 = arith.constant 1.000000e+00 : f32
    %419 = vector.broadcast %cst_82 : f32 to vector<8x32xf32>
    %420 = arith.addf %419, %418 : vector<8x32xf32>
    %421 = arith.divf %419, %420 : vector<8x32xf32>
    %422 = vector.extract_strided_slice %415 {offsets = [0, 32], sizes = [8, 32], strides = [1, 1]} : vector<8x128xf32> to vector<8x32xf32>
    %423 = arith.negf %422 : vector<8x32xf32>
    %424 = math.exp %423 : vector<8x32xf32>
    %cst_83 = arith.constant 1.000000e+00 : f32
    %425 = vector.broadcast %cst_83 : f32 to vector<8x32xf32>
    %426 = arith.addf %425, %424 : vector<8x32xf32>
    %427 = arith.divf %425, %426 : vector<8x32xf32>
    %428 = vector.extract_strided_slice %415 {offsets = [0, 64], sizes = [8, 32], strides = [1, 1]} : vector<8x128xf32> to vector<8x32xf32>
    %429 = math.tanh %428 : vector<8x32xf32>
    %430 = vector.extract_strided_slice %415 {offsets = [0, 96], sizes = [8, 32], strides = [1, 1]} : vector<8x128xf32> to vector<8x32xf32>
    %431 = arith.negf %430 : vector<8x32xf32>
    %432 = math.exp %431 : vector<8x32xf32>
    %cst_84 = arith.constant 1.000000e+00 : f32
    %433 = vector.broadcast %cst_84 : f32 to vector<8x32xf32>
    %434 = arith.addf %433, %432 : vector<8x32xf32>
    %435 = arith.divf %433, %434 : vector<8x32xf32>
    %436 = arith.mulf %427, %410 : vector<8x32xf32>
    %437 = arith.mulf %421, %429 : vector<8x32xf32>
    %438 = arith.addf %436, %437 : vector<8x32xf32>
    %439 = math.tanh %438 : vector<8x32xf32>
    %440 = arith.mulf %435, %439 : vector<8x32xf32>
    %441 = vector.extract_strided_slice %10 {offsets = [0, 0], sizes = [8, 128], strides = [1, 1]} : vector<64x128xf32> to vector<8x128xf32>
    %cst_85 = arith.constant dense<0.000000e+00> : vector<8x128xf32>
    %442 = tpu.matmul %440, %244, %cst_85 {dimension_numbers = #tpu.dot_dimension_numbers<[1], [0], [0], [1], [0, 0, 1, 1], [], []>} : vector<8x32xf32>, vector<32x128xf32>, vector<8x128xf32> -> vector<8x128xf32>
    %443 = arith.addf %441, %442 : vector<8x128xf32>
    %444 = vector.extract_strided_slice %443 {offsets = [0, 0], sizes = [8, 32], strides = [1, 1]} : vector<8x128xf32> to vector<8x32xf32>
    %445 = arith.negf %444 : vector<8x32xf32>
    %446 = math.exp %445 : vector<8x32xf32>
    %cst_86 = arith.constant 1.000000e+00 : f32
    %447 = vector.broadcast %cst_86 : f32 to vector<8x32xf32>
    %448 = arith.addf %447, %446 : vector<8x32xf32>
    %449 = arith.divf %447, %448 : vector<8x32xf32>
    %450 = vector.extract_strided_slice %443 {offsets = [0, 32], sizes = [8, 32], strides = [1, 1]} : vector<8x128xf32> to vector<8x32xf32>
    %451 = arith.negf %450 : vector<8x32xf32>
    %452 = math.exp %451 : vector<8x32xf32>
    %cst_87 = arith.constant 1.000000e+00 : f32
    %453 = vector.broadcast %cst_87 : f32 to vector<8x32xf32>
    %454 = arith.addf %453, %452 : vector<8x32xf32>
    %455 = arith.divf %453, %454 : vector<8x32xf32>
    %456 = vector.extract_strided_slice %443 {offsets = [0, 64], sizes = [8, 32], strides = [1, 1]} : vector<8x128xf32> to vector<8x32xf32>
    %457 = math.tanh %456 : vector<8x32xf32>
    %458 = vector.extract_strided_slice %443 {offsets = [0, 96], sizes = [8, 32], strides = [1, 1]} : vector<8x128xf32> to vector<8x32xf32>
    %459 = arith.negf %458 : vector<8x32xf32>
    %460 = math.exp %459 : vector<8x32xf32>
    %cst_88 = arith.constant 1.000000e+00 : f32
    %461 = vector.broadcast %cst_88 : f32 to vector<8x32xf32>
    %462 = arith.addf %461, %460 : vector<8x32xf32>
    %463 = arith.divf %461, %462 : vector<8x32xf32>
    %464 = arith.mulf %455, %438 : vector<8x32xf32>
    %465 = arith.mulf %449, %457 : vector<8x32xf32>
    %466 = arith.addf %464, %465 : vector<8x32xf32>
    %467 = math.tanh %466 : vector<8x32xf32>
    %468 = arith.mulf %463, %467 : vector<8x32xf32>
    %469 = tpu.concatenate %43, %71, %99, %127, %155, %183, %211, %239 in 0 : vector<8x32xf32>, vector<8x32xf32>, vector<8x32xf32>, vector<8x32xf32>, vector<8x32xf32>, vector<8x32xf32>, vector<8x32xf32>, vector<8x32xf32> -> vector<64x32xf32>
    %470 = tpu.concatenate %468, %440, %412, %384, %356, %328, %300, %272 in 0 : vector<8x32xf32>, vector<8x32xf32>, vector<8x32xf32>, vector<8x32xf32>, vector<8x32xf32>, vector<8x32xf32>, vector<8x32xf32>, vector<8x32xf32> -> vector<64x32xf32>
    %c0_89 = arith.constant 0 : index
    %c0_90 = arith.constant 0 : index
    %471 = vector.load %arg12[%c0_89, %c0_90] : memref<1x128xf32, #tpu.memory_space<vmem>>, vector<1x128xf32>
    %c0_91 = arith.constant 0 : index
    %c0_92 = arith.constant 0 : index
    %472 = vector.load %arg17[%c0_91, %c0_92] : memref<32x128xf32, #tpu.memory_space<vmem>>, vector<32x128xf32>
    %cst_93 = arith.constant dense<0.000000e+00> : vector<64x128xf32>
    %473 = tpu.matmul %469, %472, %cst_93 {dimension_numbers = #tpu.dot_dimension_numbers<[1], [0], [0], [1], [0, 0, 1, 1], [], []>} : vector<64x32xf32>, vector<32x128xf32>, vector<64x128xf32> -> vector<64x128xf32>
    %474 = vector.broadcast %471 : vector<1x128xf32> to vector<64x128xf32>
    %475 = arith.addf %474, %473 : vector<64x128xf32>
    %c0_94 = arith.constant 0 : index
    %c0_95 = arith.constant 0 : index
    %476 = vector.load %arg18[%c0_94, %c0_95] : memref<32x128xf32, #tpu.memory_space<vmem>>, vector<32x128xf32>
    %cst_96 = arith.constant dense<0.000000e+00> : vector<64x128xf32>
    %477 = tpu.matmul %470, %476, %cst_96 {dimension_numbers = #tpu.dot_dimension_numbers<[1], [0], [0], [1], [0, 0, 1, 1], [], []>} : vector<64x32xf32>, vector<32x128xf32>, vector<64x128xf32> -> vector<64x128xf32>
    %478 = arith.addf %475, %477 : vector<64x128xf32>
    %c0_97 = arith.constant 0 : index
    %c0_98 = arith.constant 0 : index
    %479 = vector.load %arg11[%c0_97, %c0_98] : memref<1x128xf32, #tpu.memory_space<vmem>>, vector<1x128xf32>
    %c0_99 = arith.constant 0 : index
    %c0_100 = arith.constant 0 : index
    %480 = vector.load %arg15[%c0_99, %c0_100] : memref<32x128xf32, #tpu.memory_space<vmem>>, vector<32x128xf32>
    %cst_101 = arith.constant dense<0.000000e+00> : vector<64x128xf32>
    %481 = tpu.matmul %469, %480, %cst_101 {dimension_numbers = #tpu.dot_dimension_numbers<[1], [0], [0], [1], [0, 0, 1, 1], [], []>} : vector<64x32xf32>, vector<32x128xf32>, vector<64x128xf32> -> vector<64x128xf32>
    %482 = vector.broadcast %479 : vector<1x128xf32> to vector<64x128xf32>
    %483 = arith.addf %482, %481 : vector<64x128xf32>
    %c0_102 = arith.constant 0 : index
    %c0_103 = arith.constant 0 : index
    %484 = vector.load %arg16[%c0_102, %c0_103] : memref<32x128xf32, #tpu.memory_space<vmem>>, vector<32x128xf32>
    %cst_104 = arith.constant dense<0.000000e+00> : vector<64x128xf32>
    %485 = tpu.matmul %470, %484, %cst_104 {dimension_numbers = #tpu.dot_dimension_numbers<[1], [0], [0], [1], [0, 0, 1, 1], [], []>} : vector<64x32xf32>, vector<32x128xf32>, vector<64x128xf32> -> vector<64x128xf32>
    %486 = arith.addf %483, %485 : vector<64x128xf32>
    %c2 = arith.constant 2 : index
    %c0_105 = arith.constant 0 : index
    %c0_106 = arith.constant 0 : index
    %487 = vector.load %arg4[%c2, %c0_105, %c0_106] : memref<4x8x32xf32, #tpu.memory_space<vmem>>, vector<1x8x32xf32>
    %488 = vector.shape_cast %487 : vector<1x8x32xf32> to vector<8x32xf32>
    %c2_107 = arith.constant 2 : index
    %c0_108 = arith.constant 0 : index
    %c0_109 = arith.constant 0 : index
    %489 = vector.load %arg0[%c2_107, %c0_108, %c0_109] : memref<4x8x32xf32, #tpu.memory_space<vmem>>, vector<1x8x32xf32>
    %490 = vector.shape_cast %489 : vector<1x8x32xf32> to vector<8x32xf32>
    %c0_110 = arith.constant 0 : index
    %c0_111 = arith.constant 0 : index
    %491 = vector.load %arg14[%c0_110, %c0_111] : memref<32x128xf32, #tpu.memory_space<vmem>>, vector<32x128xf32>
    %492 = vector.extract_strided_slice %478 {offsets = [0, 0], sizes = [8, 128], strides = [1, 1]} : vector<64x128xf32> to vector<8x128xf32>
    %cst_112 = arith.constant dense<0.000000e+00> : vector<8x128xf32>
    %493 = tpu.matmul %488, %491, %cst_112 {dimension_numbers = #tpu.dot_dimension_numbers<[1], [0], [0], [1], [0, 0, 1, 1], [], []>} : vector<8x32xf32>, vector<32x128xf32>, vector<8x128xf32> -> vector<8x128xf32>
    %494 = arith.addf %492, %493 : vector<8x128xf32>
    %495 = vector.extract_strided_slice %494 {offsets = [0, 0], sizes = [8, 32], strides = [1, 1]} : vector<8x128xf32> to vector<8x32xf32>
    %496 = arith.negf %495 : vector<8x32xf32>
    %497 = math.exp %496 : vector<8x32xf32>
    %cst_113 = arith.constant 1.000000e+00 : f32
    %498 = vector.broadcast %cst_113 : f32 to vector<8x32xf32>
    %499 = arith.addf %498, %497 : vector<8x32xf32>
    %500 = arith.divf %498, %499 : vector<8x32xf32>
    %501 = vector.extract_strided_slice %494 {offsets = [0, 32], sizes = [8, 32], strides = [1, 1]} : vector<8x128xf32> to vector<8x32xf32>
    %502 = arith.negf %501 : vector<8x32xf32>
    %503 = math.exp %502 : vector<8x32xf32>
    %cst_114 = arith.constant 1.000000e+00 : f32
    %504 = vector.broadcast %cst_114 : f32 to vector<8x32xf32>
    %505 = arith.addf %504, %503 : vector<8x32xf32>
    %506 = arith.divf %504, %505 : vector<8x32xf32>
    %507 = vector.extract_strided_slice %494 {offsets = [0, 64], sizes = [8, 32], strides = [1, 1]} : vector<8x128xf32> to vector<8x32xf32>
    %508 = math.tanh %507 : vector<8x32xf32>
    %509 = vector.extract_strided_slice %494 {offsets = [0, 96], sizes = [8, 32], strides = [1, 1]} : vector<8x128xf32> to vector<8x32xf32>
    %510 = arith.negf %509 : vector<8x32xf32>
    %511 = math.exp %510 : vector<8x32xf32>
    %cst_115 = arith.constant 1.000000e+00 : f32
    %512 = vector.broadcast %cst_115 : f32 to vector<8x32xf32>
    %513 = arith.addf %512, %511 : vector<8x32xf32>
    %514 = arith.divf %512, %513 : vector<8x32xf32>
    %515 = arith.mulf %506, %490 : vector<8x32xf32>
    %516 = arith.mulf %500, %508 : vector<8x32xf32>
    %517 = arith.addf %515, %516 : vector<8x32xf32>
    %518 = math.tanh %517 : vector<8x32xf32>
    %519 = arith.mulf %514, %518 : vector<8x32xf32>
    %520 = vector.extract_strided_slice %478 {offsets = [8, 0], sizes = [8, 128], strides = [1, 1]} : vector<64x128xf32> to vector<8x128xf32>
    %cst_116 = arith.constant dense<0.000000e+00> : vector<8x128xf32>
    %521 = tpu.matmul %519, %491, %cst_116 {dimension_numbers = #tpu.dot_dimension_numbers<[1], [0], [0], [1], [0, 0, 1, 1], [], []>} : vector<8x32xf32>, vector<32x128xf32>, vector<8x128xf32> -> vector<8x128xf32>
    %522 = arith.addf %520, %521 : vector<8x128xf32>
    %523 = vector.extract_strided_slice %522 {offsets = [0, 0], sizes = [8, 32], strides = [1, 1]} : vector<8x128xf32> to vector<8x32xf32>
    %524 = arith.negf %523 : vector<8x32xf32>
    %525 = math.exp %524 : vector<8x32xf32>
    %cst_117 = arith.constant 1.000000e+00 : f32
    %526 = vector.broadcast %cst_117 : f32 to vector<8x32xf32>
    %527 = arith.addf %526, %525 : vector<8x32xf32>
    %528 = arith.divf %526, %527 : vector<8x32xf32>
    %529 = vector.extract_strided_slice %522 {offsets = [0, 32], sizes = [8, 32], strides = [1, 1]} : vector<8x128xf32> to vector<8x32xf32>
    %530 = arith.negf %529 : vector<8x32xf32>
    %531 = math.exp %530 : vector<8x32xf32>
    %cst_118 = arith.constant 1.000000e+00 : f32
    %532 = vector.broadcast %cst_118 : f32 to vector<8x32xf32>
    %533 = arith.addf %532, %531 : vector<8x32xf32>
    %534 = arith.divf %532, %533 : vector<8x32xf32>
    %535 = vector.extract_strided_slice %522 {offsets = [0, 64], sizes = [8, 32], strides = [1, 1]} : vector<8x128xf32> to vector<8x32xf32>
    %536 = math.tanh %535 : vector<8x32xf32>
    %537 = vector.extract_strided_slice %522 {offsets = [0, 96], sizes = [8, 32], strides = [1, 1]} : vector<8x128xf32> to vector<8x32xf32>
    %538 = arith.negf %537 : vector<8x32xf32>
    %539 = math.exp %538 : vector<8x32xf32>
    %cst_119 = arith.constant 1.000000e+00 : f32
    %540 = vector.broadcast %cst_119 : f32 to vector<8x32xf32>
    %541 = arith.addf %540, %539 : vector<8x32xf32>
    %542 = arith.divf %540, %541 : vector<8x32xf32>
    %543 = arith.mulf %534, %517 : vector<8x32xf32>
    %544 = arith.mulf %528, %536 : vector<8x32xf32>
    %545 = arith.addf %543, %544 : vector<8x32xf32>
    %546 = math.tanh %545 : vector<8x32xf32>
    %547 = arith.mulf %542, %546 : vector<8x32xf32>
    %548 = vector.extract_strided_slice %478 {offsets = [16, 0], sizes = [8, 128], strides = [1, 1]} : vector<64x128xf32> to vector<8x128xf32>
    %cst_120 = arith.constant dense<0.000000e+00> : vector<8x128xf32>
    %549 = tpu.matmul %547, %491, %cst_120 {dimension_numbers = #tpu.dot_dimension_numbers<[1], [0], [0], [1], [0, 0, 1, 1], [], []>} : vector<8x32xf32>, vector<32x128xf32>, vector<8x128xf32> -> vector<8x128xf32>
    %550 = arith.addf %548, %549 : vector<8x128xf32>
    %551 = vector.extract_strided_slice %550 {offsets = [0, 0], sizes = [8, 32], strides = [1, 1]} : vector<8x128xf32> to vector<8x32xf32>
    %552 = arith.negf %551 : vector<8x32xf32>
    %553 = math.exp %552 : vector<8x32xf32>
    %cst_121 = arith.constant 1.000000e+00 : f32
    %554 = vector.broadcast %cst_121 : f32 to vector<8x32xf32>
    %555 = arith.addf %554, %553 : vector<8x32xf32>
    %556 = arith.divf %554, %555 : vector<8x32xf32>
    %557 = vector.extract_strided_slice %550 {offsets = [0, 32], sizes = [8, 32], strides = [1, 1]} : vector<8x128xf32> to vector<8x32xf32>
    %558 = arith.negf %557 : vector<8x32xf32>
    %559 = math.exp %558 : vector<8x32xf32>
    %cst_122 = arith.constant 1.000000e+00 : f32
    %560 = vector.broadcast %cst_122 : f32 to vector<8x32xf32>
    %561 = arith.addf %560, %559 : vector<8x32xf32>
    %562 = arith.divf %560, %561 : vector<8x32xf32>
    %563 = vector.extract_strided_slice %550 {offsets = [0, 64], sizes = [8, 32], strides = [1, 1]} : vector<8x128xf32> to vector<8x32xf32>
    %564 = math.tanh %563 : vector<8x32xf32>
    %565 = vector.extract_strided_slice %550 {offsets = [0, 96], sizes = [8, 32], strides = [1, 1]} : vector<8x128xf32> to vector<8x32xf32>
    %566 = arith.negf %565 : vector<8x32xf32>
    %567 = math.exp %566 : vector<8x32xf32>
    %cst_123 = arith.constant 1.000000e+00 : f32
    %568 = vector.broadcast %cst_123 : f32 to vector<8x32xf32>
    %569 = arith.addf %568, %567 : vector<8x32xf32>
    %570 = arith.divf %568, %569 : vector<8x32xf32>
    %571 = arith.mulf %562, %545 : vector<8x32xf32>
    %572 = arith.mulf %556, %564 : vector<8x32xf32>
    %573 = arith.addf %571, %572 : vector<8x32xf32>
    %574 = math.tanh %573 : vector<8x32xf32>
    %575 = arith.mulf %570, %574 : vector<8x32xf32>
    %576 = vector.extract_strided_slice %478 {offsets = [24, 0], sizes = [8, 128], strides = [1, 1]} : vector<64x128xf32> to vector<8x128xf32>
    %cst_124 = arith.constant dense<0.000000e+00> : vector<8x128xf32>
    %577 = tpu.matmul %575, %491, %cst_124 {dimension_numbers = #tpu.dot_dimension_numbers<[1], [0], [0], [1], [0, 0, 1, 1], [], []>} : vector<8x32xf32>, vector<32x128xf32>, vector<8x128xf32> -> vector<8x128xf32>
    %578 = arith.addf %576, %577 : vector<8x128xf32>
    %579 = vector.extract_strided_slice %578 {offsets = [0, 0], sizes = [8, 32], strides = [1, 1]} : vector<8x128xf32> to vector<8x32xf32>
    %580 = arith.negf %579 : vector<8x32xf32>
    %581 = math.exp %580 : vector<8x32xf32>
    %cst_125 = arith.constant 1.000000e+00 : f32
    %582 = vector.broadcast %cst_125 : f32 to vector<8x32xf32>
    %583 = arith.addf %582, %581 : vector<8x32xf32>
    %584 = arith.divf %582, %583 : vector<8x32xf32>
    %585 = vector.extract_strided_slice %578 {offsets = [0, 32], sizes = [8, 32], strides = [1, 1]} : vector<8x128xf32> to vector<8x32xf32>
    %586 = arith.negf %585 : vector<8x32xf32>
    %587 = math.exp %586 : vector<8x32xf32>
    %cst_126 = arith.constant 1.000000e+00 : f32
    %588 = vector.broadcast %cst_126 : f32 to vector<8x32xf32>
    %589 = arith.addf %588, %587 : vector<8x32xf32>
    %590 = arith.divf %588, %589 : vector<8x32xf32>
    %591 = vector.extract_strided_slice %578 {offsets = [0, 64], sizes = [8, 32], strides = [1, 1]} : vector<8x128xf32> to vector<8x32xf32>
    %592 = math.tanh %591 : vector<8x32xf32>
    %593 = vector.extract_strided_slice %578 {offsets = [0, 96], sizes = [8, 32], strides = [1, 1]} : vector<8x128xf32> to vector<8x32xf32>
    %594 = arith.negf %593 : vector<8x32xf32>
    %595 = math.exp %594 : vector<8x32xf32>
    %cst_127 = arith.constant 1.000000e+00 : f32
    %596 = vector.broadcast %cst_127 : f32 to vector<8x32xf32>
    %597 = arith.addf %596, %595 : vector<8x32xf32>
    %598 = arith.divf %596, %597 : vector<8x32xf32>
    %599 = arith.mulf %590, %573 : vector<8x32xf32>
    %600 = arith.mulf %584, %592 : vector<8x32xf32>
    %601 = arith.addf %599, %600 : vector<8x32xf32>
    %602 = math.tanh %601 : vector<8x32xf32>
    %603 = arith.mulf %598, %602 : vector<8x32xf32>
    %604 = vector.extract_strided_slice %478 {offsets = [32, 0], sizes = [8, 128], strides = [1, 1]} : vector<64x128xf32> to vector<8x128xf32>
    %cst_128 = arith.constant dense<0.000000e+00> : vector<8x128xf32>
    %605 = tpu.matmul %603, %491, %cst_128 {dimension_numbers = #tpu.dot_dimension_numbers<[1], [0], [0], [1], [0, 0, 1, 1], [], []>} : vector<8x32xf32>, vector<32x128xf32>, vector<8x128xf32> -> vector<8x128xf32>
    %606 = arith.addf %604, %605 : vector<8x128xf32>
    %607 = vector.extract_strided_slice %606 {offsets = [0, 0], sizes = [8, 32], strides = [1, 1]} : vector<8x128xf32> to vector<8x32xf32>
    %608 = arith.negf %607 : vector<8x32xf32>
    %609 = math.exp %608 : vector<8x32xf32>
    %cst_129 = arith.constant 1.000000e+00 : f32
    %610 = vector.broadcast %cst_129 : f32 to vector<8x32xf32>
    %611 = arith.addf %610, %609 : vector<8x32xf32>
    %612 = arith.divf %610, %611 : vector<8x32xf32>
    %613 = vector.extract_strided_slice %606 {offsets = [0, 32], sizes = [8, 32], strides = [1, 1]} : vector<8x128xf32> to vector<8x32xf32>
    %614 = arith.negf %613 : vector<8x32xf32>
    %615 = math.exp %614 : vector<8x32xf32>
    %cst_130 = arith.constant 1.000000e+00 : f32
    %616 = vector.broadcast %cst_130 : f32 to vector<8x32xf32>
    %617 = arith.addf %616, %615 : vector<8x32xf32>
    %618 = arith.divf %616, %617 : vector<8x32xf32>
    %619 = vector.extract_strided_slice %606 {offsets = [0, 64], sizes = [8, 32], strides = [1, 1]} : vector<8x128xf32> to vector<8x32xf32>
    %620 = math.tanh %619 : vector<8x32xf32>
    %621 = vector.extract_strided_slice %606 {offsets = [0, 96], sizes = [8, 32], strides = [1, 1]} : vector<8x128xf32> to vector<8x32xf32>
    %622 = arith.negf %621 : vector<8x32xf32>
    %623 = math.exp %622 : vector<8x32xf32>
    %cst_131 = arith.constant 1.000000e+00 : f32
    %624 = vector.broadcast %cst_131 : f32 to vector<8x32xf32>
    %625 = arith.addf %624, %623 : vector<8x32xf32>
    %626 = arith.divf %624, %625 : vector<8x32xf32>
    %627 = arith.mulf %618, %601 : vector<8x32xf32>
    %628 = arith.mulf %612, %620 : vector<8x32xf32>
    %629 = arith.addf %627, %628 : vector<8x32xf32>
    %630 = math.tanh %629 : vector<8x32xf32>
    %631 = arith.mulf %626, %630 : vector<8x32xf32>
    %632 = vector.extract_strided_slice %478 {offsets = [40, 0], sizes = [8, 128], strides = [1, 1]} : vector<64x128xf32> to vector<8x128xf32>
    %cst_132 = arith.constant dense<0.000000e+00> : vector<8x128xf32>
    %633 = tpu.matmul %631, %491, %cst_132 {dimension_numbers = #tpu.dot_dimension_numbers<[1], [0], [0], [1], [0, 0, 1, 1], [], []>} : vector<8x32xf32>, vector<32x128xf32>, vector<8x128xf32> -> vector<8x128xf32>
    %634 = arith.addf %632, %633 : vector<8x128xf32>
    %635 = vector.extract_strided_slice %634 {offsets = [0, 0], sizes = [8, 32], strides = [1, 1]} : vector<8x128xf32> to vector<8x32xf32>
    %636 = arith.negf %635 : vector<8x32xf32>
    %637 = math.exp %636 : vector<8x32xf32>
    %cst_133 = arith.constant 1.000000e+00 : f32
    %638 = vector.broadcast %cst_133 : f32 to vector<8x32xf32>
    %639 = arith.addf %638, %637 : vector<8x32xf32>
    %640 = arith.divf %638, %639 : vector<8x32xf32>
    %641 = vector.extract_strided_slice %634 {offsets = [0, 32], sizes = [8, 32], strides = [1, 1]} : vector<8x128xf32> to vector<8x32xf32>
    %642 = arith.negf %641 : vector<8x32xf32>
    %643 = math.exp %642 : vector<8x32xf32>
    %cst_134 = arith.constant 1.000000e+00 : f32
    %644 = vector.broadcast %cst_134 : f32 to vector<8x32xf32>
    %645 = arith.addf %644, %643 : vector<8x32xf32>
    %646 = arith.divf %644, %645 : vector<8x32xf32>
    %647 = vector.extract_strided_slice %634 {offsets = [0, 64], sizes = [8, 32], strides = [1, 1]} : vector<8x128xf32> to vector<8x32xf32>
    %648 = math.tanh %647 : vector<8x32xf32>
    %649 = vector.extract_strided_slice %634 {offsets = [0, 96], sizes = [8, 32], strides = [1, 1]} : vector<8x128xf32> to vector<8x32xf32>
    %650 = arith.negf %649 : vector<8x32xf32>
    %651 = math.exp %650 : vector<8x32xf32>
    %cst_135 = arith.constant 1.000000e+00 : f32
    %652 = vector.broadcast %cst_135 : f32 to vector<8x32xf32>
    %653 = arith.addf %652, %651 : vector<8x32xf32>
    %654 = arith.divf %652, %653 : vector<8x32xf32>
    %655 = arith.mulf %646, %629 : vector<8x32xf32>
    %656 = arith.mulf %640, %648 : vector<8x32xf32>
    %657 = arith.addf %655, %656 : vector<8x32xf32>
    %658 = math.tanh %657 : vector<8x32xf32>
    %659 = arith.mulf %654, %658 : vector<8x32xf32>
    %660 = vector.extract_strided_slice %478 {offsets = [48, 0], sizes = [8, 128], strides = [1, 1]} : vector<64x128xf32> to vector<8x128xf32>
    %cst_136 = arith.constant dense<0.000000e+00> : vector<8x128xf32>
    %661 = tpu.matmul %659, %491, %cst_136 {dimension_numbers = #tpu.dot_dimension_numbers<[1], [0], [0], [1], [0, 0, 1, 1], [], []>} : vector<8x32xf32>, vector<32x128xf32>, vector<8x128xf32> -> vector<8x128xf32>
    %662 = arith.addf %660, %661 : vector<8x128xf32>
    %663 = vector.extract_strided_slice %662 {offsets = [0, 0], sizes = [8, 32], strides = [1, 1]} : vector<8x128xf32> to vector<8x32xf32>
    %664 = arith.negf %663 : vector<8x32xf32>
    %665 = math.exp %664 : vector<8x32xf32>
    %cst_137 = arith.constant 1.000000e+00 : f32
    %666 = vector.broadcast %cst_137 : f32 to vector<8x32xf32>
    %667 = arith.addf %666, %665 : vector<8x32xf32>
    %668 = arith.divf %666, %667 : vector<8x32xf32>
    %669 = vector.extract_strided_slice %662 {offsets = [0, 32], sizes = [8, 32], strides = [1, 1]} : vector<8x128xf32> to vector<8x32xf32>
    %670 = arith.negf %669 : vector<8x32xf32>
    %671 = math.exp %670 : vector<8x32xf32>
    %cst_138 = arith.constant 1.000000e+00 : f32
    %672 = vector.broadcast %cst_138 : f32 to vector<8x32xf32>
    %673 = arith.addf %672, %671 : vector<8x32xf32>
    %674 = arith.divf %672, %673 : vector<8x32xf32>
    %675 = vector.extract_strided_slice %662 {offsets = [0, 64], sizes = [8, 32], strides = [1, 1]} : vector<8x128xf32> to vector<8x32xf32>
    %676 = math.tanh %675 : vector<8x32xf32>
    %677 = vector.extract_strided_slice %662 {offsets = [0, 96], sizes = [8, 32], strides = [1, 1]} : vector<8x128xf32> to vector<8x32xf32>
    %678 = arith.negf %677 : vector<8x32xf32>
    %679 = math.exp %678 : vector<8x32xf32>
    %cst_139 = arith.constant 1.000000e+00 : f32
    %680 = vector.broadcast %cst_139 : f32 to vector<8x32xf32>
    %681 = arith.addf %680, %679 : vector<8x32xf32>
    %682 = arith.divf %680, %681 : vector<8x32xf32>
    %683 = arith.mulf %674, %657 : vector<8x32xf32>
    %684 = arith.mulf %668, %676 : vector<8x32xf32>
    %685 = arith.addf %683, %684 : vector<8x32xf32>
    %686 = math.tanh %685 : vector<8x32xf32>
    %687 = arith.mulf %682, %686 : vector<8x32xf32>
    %688 = vector.extract_strided_slice %478 {offsets = [56, 0], sizes = [8, 128], strides = [1, 1]} : vector<64x128xf32> to vector<8x128xf32>
    %cst_140 = arith.constant dense<0.000000e+00> : vector<8x128xf32>
    %689 = tpu.matmul %687, %491, %cst_140 {dimension_numbers = #tpu.dot_dimension_numbers<[1], [0], [0], [1], [0, 0, 1, 1], [], []>} : vector<8x32xf32>, vector<32x128xf32>, vector<8x128xf32> -> vector<8x128xf32>
    %690 = arith.addf %688, %689 : vector<8x128xf32>
    %691 = vector.extract_strided_slice %690 {offsets = [0, 0], sizes = [8, 32], strides = [1, 1]} : vector<8x128xf32> to vector<8x32xf32>
    %692 = arith.negf %691 : vector<8x32xf32>
    %693 = math.exp %692 : vector<8x32xf32>
    %cst_141 = arith.constant 1.000000e+00 : f32
    %694 = vector.broadcast %cst_141 : f32 to vector<8x32xf32>
    %695 = arith.addf %694, %693 : vector<8x32xf32>
    %696 = arith.divf %694, %695 : vector<8x32xf32>
    %697 = vector.extract_strided_slice %690 {offsets = [0, 32], sizes = [8, 32], strides = [1, 1]} : vector<8x128xf32> to vector<8x32xf32>
    %698 = arith.negf %697 : vector<8x32xf32>
    %699 = math.exp %698 : vector<8x32xf32>
    %cst_142 = arith.constant 1.000000e+00 : f32
    %700 = vector.broadcast %cst_142 : f32 to vector<8x32xf32>
    %701 = arith.addf %700, %699 : vector<8x32xf32>
    %702 = arith.divf %700, %701 : vector<8x32xf32>
    %703 = vector.extract_strided_slice %690 {offsets = [0, 64], sizes = [8, 32], strides = [1, 1]} : vector<8x128xf32> to vector<8x32xf32>
    %704 = math.tanh %703 : vector<8x32xf32>
    %705 = vector.extract_strided_slice %690 {offsets = [0, 96], sizes = [8, 32], strides = [1, 1]} : vector<8x128xf32> to vector<8x32xf32>
    %706 = arith.negf %705 : vector<8x32xf32>
    %707 = math.exp %706 : vector<8x32xf32>
    %cst_143 = arith.constant 1.000000e+00 : f32
    %708 = vector.broadcast %cst_143 : f32 to vector<8x32xf32>
    %709 = arith.addf %708, %707 : vector<8x32xf32>
    %710 = arith.divf %708, %709 : vector<8x32xf32>
    %711 = arith.mulf %702, %685 : vector<8x32xf32>
    %712 = arith.mulf %696, %704 : vector<8x32xf32>
    %713 = arith.addf %711, %712 : vector<8x32xf32>
    %714 = math.tanh %713 : vector<8x32xf32>
    %715 = arith.mulf %710, %714 : vector<8x32xf32>
    %c3 = arith.constant 3 : index
    %c0_144 = arith.constant 0 : index
    %c0_145 = arith.constant 0 : index
    %716 = vector.load %arg4[%c3, %c0_144, %c0_145] : memref<4x8x32xf32, #tpu.memory_space<vmem>>, vector<1x8x32xf32>
    %717 = vector.shape_cast %716 : vector<1x8x32xf32> to vector<8x32xf32>
    %c3_146 = arith.constant 3 : index
    %c0_147 = arith.constant 0 : index
    %c0_148 = arith.constant 0 : index
    %718 = vector.load %arg0[%c3_146, %c0_147, %c0_148] : memref<4x8x32xf32, #tpu.memory_space<vmem>>, vector<1x8x32xf32>
    %719 = vector.shape_cast %718 : vector<1x8x32xf32> to vector<8x32xf32>
    %c0_149 = arith.constant 0 : index
    %c0_150 = arith.constant 0 : index
    %720 = vector.load %arg13[%c0_149, %c0_150] : memref<32x128xf32, #tpu.memory_space<vmem>>, vector<32x128xf32>
    %721 = vector.extract_strided_slice %486 {offsets = [56, 0], sizes = [8, 128], strides = [1, 1]} : vector<64x128xf32> to vector<8x128xf32>
    %cst_151 = arith.constant dense<0.000000e+00> : vector<8x128xf32>
    %722 = tpu.matmul %717, %720, %cst_151 {dimension_numbers = #tpu.dot_dimension_numbers<[1], [0], [0], [1], [0, 0, 1, 1], [], []>} : vector<8x32xf32>, vector<32x128xf32>, vector<8x128xf32> -> vector<8x128xf32>
    %723 = arith.addf %721, %722 : vector<8x128xf32>
    %724 = vector.extract_strided_slice %723 {offsets = [0, 0], sizes = [8, 32], strides = [1, 1]} : vector<8x128xf32> to vector<8x32xf32>
    %725 = arith.negf %724 : vector<8x32xf32>
    %726 = math.exp %725 : vector<8x32xf32>
    %cst_152 = arith.constant 1.000000e+00 : f32
    %727 = vector.broadcast %cst_152 : f32 to vector<8x32xf32>
    %728 = arith.addf %727, %726 : vector<8x32xf32>
    %729 = arith.divf %727, %728 : vector<8x32xf32>
    %730 = vector.extract_strided_slice %723 {offsets = [0, 32], sizes = [8, 32], strides = [1, 1]} : vector<8x128xf32> to vector<8x32xf32>
    %731 = arith.negf %730 : vector<8x32xf32>
    %732 = math.exp %731 : vector<8x32xf32>
    %cst_153 = arith.constant 1.000000e+00 : f32
    %733 = vector.broadcast %cst_153 : f32 to vector<8x32xf32>
    %734 = arith.addf %733, %732 : vector<8x32xf32>
    %735 = arith.divf %733, %734 : vector<8x32xf32>
    %736 = vector.extract_strided_slice %723 {offsets = [0, 64], sizes = [8, 32], strides = [1, 1]} : vector<8x128xf32> to vector<8x32xf32>
    %737 = math.tanh %736 : vector<8x32xf32>
    %738 = vector.extract_strided_slice %723 {offsets = [0, 96], sizes = [8, 32], strides = [1, 1]} : vector<8x128xf32> to vector<8x32xf32>
    %739 = arith.negf %738 : vector<8x32xf32>
    %740 = math.exp %739 : vector<8x32xf32>
    %cst_154 = arith.constant 1.000000e+00 : f32
    %741 = vector.broadcast %cst_154 : f32 to vector<8x32xf32>
    %742 = arith.addf %741, %740 : vector<8x32xf32>
    %743 = arith.divf %741, %742 : vector<8x32xf32>
    %744 = arith.mulf %735, %719 : vector<8x32xf32>
    %745 = arith.mulf %729, %737 : vector<8x32xf32>
    %746 = arith.addf %744, %745 : vector<8x32xf32>
    %747 = math.tanh %746 : vector<8x32xf32>
    %748 = arith.mulf %743, %747 : vector<8x32xf32>
    %c0_155 = arith.constant 0 : index
    %c0_156 = arith.constant 0 : index
    %749 = vector.load %arg3[%c0_155, %c0_156] : memref<32x8xf32, #tpu.memory_space<vmem>>, vector<32x8xf32>
    %cst_157 = arith.constant dense<0.000000e+00> : vector<8x8xf32>
    %750 = tpu.matmul %715, %749, %cst_157 {dimension_numbers = #tpu.dot_dimension_numbers<[1], [0], [0], [1], [0, 0, 1, 1], [], []>} : vector<8x32xf32>, vector<32x8xf32>, vector<8x8xf32> -> vector<8x8xf32>
    %c0_158 = arith.constant 0 : index
    %c0_159 = arith.constant 0 : index
    %751 = vector.load %arg2[%c0_158, %c0_159] : memref<32x8xf32, #tpu.memory_space<vmem>>, vector<32x8xf32>
    %cst_160 = arith.constant dense<0.000000e+00> : vector<8x8xf32>
    %752 = tpu.matmul %748, %751, %cst_160 {dimension_numbers = #tpu.dot_dimension_numbers<[1], [0], [0], [1], [0, 0, 1, 1], [], []>} : vector<8x32xf32>, vector<32x8xf32>, vector<8x8xf32> -> vector<8x8xf32>
    %753 = arith.addf %750, %752 : vector<8x8xf32>
    %c0_161 = arith.constant 0 : index
    %c0_162 = arith.constant 0 : index
    %754 = vector.load %arg1[%c0_161, %c0_162] : memref<1x8xf32, #tpu.memory_space<vmem>>, vector<1x8xf32>
    %755 = vector.broadcast %754 : vector<1x8xf32> to vector<8x8xf32>
    %756 = arith.addf %753, %755 : vector<8x8xf32>
    %c0_163 = arith.constant 0 : index
    %c0_164 = arith.constant 0 : index
    %757 = vector.load %arg20[%c0_163, %c0_164] : memref<8x8xf32, #tpu.memory_space<vmem>>, vector<8x8xf32>
    tpu.vector_store %arg20[%c0_163, %c0_164], %756 {strides = array<i32>} : memref<8x8xf32, #tpu.memory_space<vmem>>, vector<8x8xf32>,
    return
  }
}

</mosaic_0001>

<bundles_post_ra>
// kernel: bilstm_forward.1
= control target key start
LH: loop header
LB: loop body
LE: loop exit
PB: predicated region body
PF: predicated region fallthrough
CT: control target
= control target key end

     0   :  { %s5592_s0 = inlined_call_operand.vmem [shape: f32[4,8,32], index: 0, kind: input, shape index: {}]   ;;  %s5593_s1 = inlined_call_operand.vmem [shape: f32[1,8], index: 1, kind: input, shape index: {}]   ;;  %s5594_s2 = inlined_call_operand.vmem [shape: f32[32,8], index: 2, kind: input, shape index: {}]   ;;  %s5595_s3 = inlined_call_operand.vmem [shape: f32[32,8], index: 3, kind: input, shape index: {}]   ;;  %s5596_s4 = inlined_call_operand.vmem [shape: f32[4,8,32], index: 4, kind: input, shape index: {}]   ;;  %s5597_s5 = inlined_call_operand.vmem [shape: f32[1,128], index: 5, kind: input, shape index: {}]   ;;  %s5598_s6 = inlined_call_operand.vmem [shape: f32[1,128], index: 6, kind: input, shape index: {}]   ;;  %s5599_s7 = inlined_call_operand.vmem [shape: f32[32,128], index: 7, kind: input, shape index: {}]   ;;  %s5600_s8 = inlined_call_operand.vmem [shape: f32[32,128], index: 8, kind: input, shape index: {}]   ;;  %s5601_s9 = inlined_call_operand.vmem [shape: f32[8,128], index: 9, kind: input, shape index: {}]   ;;  %s5602_s10 = inlined_call_operand.vmem [shape: f32[8,128], index: 10, kind: input, shape index: {}]   ;;  %s5603_s11 = inlined_call_operand.hbm [shape: f32[1,128], index: 11, kind: input, shape index: {}]   ;;  %s5604_s12 = inlined_call_operand.hbm [shape: f32[1,128], index: 12, kind: input, shape index: {}]   ;;  %s5605_s13 = inlined_call_operand.vmem [shape: f32[32,128], index: 13, kind: input, shape index: {}]   ;;  %s5606_s14 = inlined_call_operand.vmem [shape: f32[32,128], index: 14, kind: input, shape index: {}]   ;;  %s5607_s15 = inlined_call_operand.vmem [shape: f32[32,128], index: 15, kind: input, shape index: {}]   ;;  %s5608_s16 = inlined_call_operand.vmem [shape: f32[32,128], index: 16, kind: input, shape index: {}]   ;;  %s5609_s17 = inlined_call_operand.vmem [shape: f32[32,128], index: 17, kind: input, shape index: {}]   ;;  %s5610_s18 = inlined_call_operand.vmem [shape: f32[32,128], index: 18, kind: input, shape index: {}]   ;;  %s5611_s19 = inlined_call_operand.vmem [shape: f32[64,8], index: 19, kind: input, shape index: {}]   ;;  %s5612_s20 = inlined_call_operand.vmem [shape: f32[8,8], index: 20, kind: output, shape index: {}]  }
   0x1   :  { %5617 = sst [smem:[#allocation8_spill]] %s5592_s0 }
   0x2   :  { %5618 = sst [smem:[#allocation9_spill]] %s5593_s1 }
   0x3   :  { %5619 = sst [smem:[#allocation10_spill]] %s5594_s2 }
   0x4   :  { %5620 = sst [smem:[#allocation11_spill]] %s5595_s3 }
   0x5   :  { %5621 = sst [smem:[#allocation12_spill]] %s5596_s4 }
   0x6   :  { %25 = vsyncpa [#allocation3], 0 }
   0x7   :  { %26 = vsyncpa [#allocation5], 0  ;;  %s4729_s1 = smov [#allocation2]   ;;  %s4730_s23 = smov [#allocation4]  }
   0x8   :  { %s55_s22 = sshll.u32 %s4729_s1, 4  ;;  %s65_s24 = sshll.u32 %s4730_s23, 4  ;;  %s56_s22 = int_to_ptr.vmem [resolvable:$true] %s55_s22  ;;  %s66_s24 = int_to_ptr.vmem [resolvable:$true] %s65_s24 }
   0x9   :  { %s4681_s3 = scalar_lea.hbm %s5603_s11, 16 }
   0xa   :  { %p4682_p0 = scmp.ne.s32.totalorder %s5603_s11, %s4681_s3  ;;  %p4685_p1 = scmp.lt.u32.totalorder %s4681_s3, %s5603_s11 }
   0xc   :  { %p4687_p2 = pnand %p4685_p1, %p4682_p0 }
   0xe   :  { %4690 = shalt.err (!%p4687_p2)
}
   0xf   :  { %s4691_s29 = scalar_lea.vmem %s56_s22, 16  ;;  %s4695_s30 = scalar_lea.vmem %s56_s22, 32 }
  0x10   :  { %p4692_p3 = scmp.ne.s32.totalorder %s56_s22, %s4691_s29  ;;  %p4696_p4 = scmp.lt.s32.totalorder %s56_s22, %s56_s22 }
  0x11   :  { %p4697_p5 = scmp.lt.s32.totalorder %s4695_s30, %s4691_s29 }
  0x13   :  { %p4698_p6 = por %p4697_p5, %p4696_p4 }
  0x15   :  { %p4699_p7 = pnand %p4698_p6, %p4692_p3 }
  0x17   :  { %4702 = shalt.err (!%p4699_p7)
}
  0x18   :  { %58 = dma.hbm_to_vmem [thread:$0]  %s5603_s11, 16, %s56_s22, [#allocation3]  }
  0x19   :  { %s4703_s2 = scalar_lea.hbm %s5604_s12, 16 }
  0x1a   :  { %p4704_p8 = scmp.ne.s32.totalorder %s5604_s12, %s4703_s2  ;;  %p4707_p9 = scmp.lt.u32.totalorder %s4703_s2, %s5604_s12 }
  0x1c   :  { %p4709_p10 = pnand %p4707_p9, %p4704_p8 }
  0x1e   :  { %4712 = shalt.err (!%p4709_p10)
}
  0x1f   :  { %s4713_s28 = scalar_lea.vmem %s66_s24, 16  ;;  %s4717_s4 = scalar_lea.vmem %s66_s24, 32 }
  0x20   :  { %p4714_p11 = scmp.ne.s32.totalorder %s66_s24, %s4713_s28  ;;  %p4718_p12 = scmp.lt.s32.totalorder %s66_s24, %s66_s24 }
  0x21   :  { %p4719_p13 = scmp.lt.s32.totalorder %s4717_s4, %s4713_s28 }
  0x23   :  { %p4720_p0 = por %p4719_p13, %p4718_p12 }
  0x25   :  { %p4721_p1 = pnand %p4720_p0, %p4714_p11 }
  0x27   :  { %4724 = shalt.err (!%p4721_p1)
}
  0x28   :  { %68 = dma.hbm_to_vmem [thread:$0]  %s5604_s12, 16, %s66_s24, [#allocation5]  }
  0x29   :  { %4725 = dma.done.wait [#allocation3], 16  }
  0x2a   :  { %4726 = vsyncadd [#allocation3], 4294967280 }
  0x2b   :  { %4727 = dma.done.wait [#allocation5], 16  }
  0x2c   :  { %4728 = vsyncadd [#allocation5], 4294967280  ;;  %vm99_vm0 = vcmask 64512   ;;  %v98_v0 = vld [vmem:[%s5602_s10] sm:$0xff]  ;;  %v4876_v2 = vld [vmem:[%s5611_s19 + $0x8] sm:$0xff]  ;;  %v4731_v8 = vmov 0.0|0.0  }
  0x2d   :  { %v4871_v1 = vld [vmem:[%s5611_s19] sm:$0xff]  ;;  %3852 = vmatprep.subr.mxu0 %v98_v0  ;;  %v367_v4 = vld [vmem:[%s5600_s8 + $0x8] sm:$0xff]  ;;  %v4889_v5 = vld [vmem:[%s5611_s19 + $0x10] sm:$0xff]  ;;  %4451 = vmatprep.subr.mxu1 %v98_v0  ;;  %vm4732_vm1 = vmmov 0   ;;  %v4733_v14 = vmov 0.0   ;;  %s5622_s23 = sld [smem:[#allocation12_spill]] }
  0x2e   :  { %3854 = vmatprep.mubr.msk.f32.mxu0 %vm99_vm0, %v4871_v1  ;;  %v366_v3 = vld [vmem:[%s5600_s8] sm:$0xff]  ;;  %3853 = vmatpush3.msra.mxu0 %v98_v0  ;;  %v368_v7 = vld [vmem:[%s5600_s8 + $0x10] sm:$0xff]  ;;  %v369_v9 = vld [vmem:[%s5600_s8 + $0x18] sm:$0xff]  ;;  %vm370_vm2 = vcmask 261120   ;;  %s4734_s2 = smov 64   ;;  %s5623_s3 = sld [smem:[#allocation8_spill]] }
  0x2f   :  { %v4891_v6 = vpack.c.bf16 %v367_v4, %v366_v3  ;;  %3855 = vmatmul.mubr.msk.f32.vlgmr.msra.gmra.mrb[0].mxu0 %vm99_vm0, %v4876_v2  ;;  %4257 = vmatprep.subr.bf16.mxu0 %v4731_v8  ;;  %v4908_v10 = vld [vmem:[%s5611_s19 + $0x18] sm:$0xff]  ;;  %v4910_v11 = vpack.c.bf16 %v369_v9, %v368_v7  ;;  %v4916_v12 = vld [vmem:[%s5611_s19 + $0x20] sm:$0xff]  ;;  %v4926_v13 = vld [vmem:[%s5611_s19 + $0x28] sm:$0xff]  ;;  %s5625_s21 = sld [smem:[#allocation11_spill]]  ;;  %s5626_s25 = sld [smem:[#allocation9_spill]] }
  0x30   :  { %3857 = vmatprep.mubr.msk.f32.mxu0 %vm99_vm0, %v4889_v5  ;;  %4452 = vmatpush3.msra.mxu1 %v98_v0  ;;  %v4952_v20 = vld [vmem:[%s5598_s6] ss:$0 sm:$0xff]  ;;  %s4735_s6 = smov 32   ;;  %v95_v39 = vld [vmem:[%s5611_s19 + $0x30] sm:$0xff]  ;;  %v96_v40 = vld [vmem:[%s5611_s19 + $0x38] sm:$0xff] }
  0x31   :  { %4259 = vmatpush3.bf16.msra.mxu0 %v4891_v6  ;;  %v244_v41 = vld [vmem:[%s5601_s9] sm:$0xff]  ;;  %3863 = vmatprep.mubr.msk.f32.mxu1 %vm99_vm0, %v95_v39 }
  0x32   :  { %4260 = vmatprep.subr.bf16.mxu0 %v4731_v8  ;;  %3866 = vmatprep.subr.mxu1 %v244_v41  ;;  %v5009_v47 = vld [vmem:[%s5597_s5] ss:$0 sm:$0xff] }
  0x33   :  { %3858 = vmatmul.mubr.msk.f32.gmra.mrb[2].mxu0 %vm99_vm0, %v4908_v10  ;;  %v364_v15 = vld [vmem:[%s5622_s23] sm:$0xff]  ;;  %3864 = vmatmul.mubr.msk.f32.vlgmr.msra.gmra.mrb[0].mxu1 %vm99_vm0, %v96_v40 }
  0x34   :  { %3860 = vmatprep.mubr.msk.f32.mxu0 %vm99_vm0, %v4916_v12  ;;  %v365_v28 = vld [vmem:[%s5623_s3] sm:$0xff]  ;;  %3867 = vmatpush3.msra.mxu1 %v244_v41 }
  0x35   :  { %4262 = vmatpush3.bf16.msra.mxu0 %v4910_v11  ;;  %3868 = vmatprep.mubr.msk.f32.mxu1 %vm99_vm0, %v4871_v1 }
  0x36   :  { %4269 = vmatprep.subr.bf16.mxu0 %v4731_v8  ;;  %4263 = vmatprep.subr.bf16.mxu1 %v4731_v8 }
  0x37   :  { %3861 = vmatmul.mubr.msk.f32.gmra.mrb[4].mxu0 %vm99_vm0, %v4926_v13  ;;  %3869 = vmatmul.mubr.msk.f32.vlgmr.msra.gmra.mrb[2].mxu1 %vm99_vm0, %v4876_v2 }
  0x38   :  { %3888 = vmatprep.mubr.msk.f32.mxu0 %vm4732_vm1, %v4733_v14  ;;  %4265 = vmatpush3.bf16.msra.mxu1 %v4891_v6 }
  0x39   :  { %3871 = vmatprep.mubr.msk.f32.mxu1 %vm99_vm0, %v4889_v5  ;;  %4266 = vmatprep.subr.bf16.mxu1 %v4731_v8 }
  0x3b   :  { %3889 = vmatmul.mubr.msk.f32.vlgmr.msra.gmra.mrb[6].mxu0 %vm370_vm2, %v364_v15  ;;  %3872 = vmatmul.mubr.msk.f32.gmra.mrb[4].mxu1 %vm99_vm0, %v4908_v10 }
  0x3c   :  { %4271 = vmatpush3.bf16.msra.mxu0 %v4891_v6  ;;  %3910 = vmatprep.mubr.msk.f32.mxu0 %vm4732_vm1, %v4733_v14 }
  0x3d   :  { %4272 = vmatprep.subr.bf16.mxu0 %v4731_v8  ;;  %3874 = vmatprep.mubr.msk.f32.mxu1 %vm99_vm0, %v4916_v12 }
  0x3e   :  { %4268 = vmatpush3.bf16.msra.mxu1 %v4910_v11 }
  0x3f   :  { %4275 = vmatprep.subr.bf16.mxu1 %v4731_v8  ;;  %3875 = vmatmul.mubr.msk.f32.gmra.mrb[6].mxu1 %vm99_vm0, %v4926_v13 }
  0x40   :  { %4274 = vmatpush3.bf16.msra.mxu0 %v4910_v11  ;;  %3877 = vmatprep.mubr.msk.f32.mxu1 %vm99_vm0, %v95_v39 }
  0x41   :  { %4281 = vmatprep.subr.bf16.mxu0 %v4731_v8 }
  0x43   :  { %3878 = vmatmul.mubr.msk.f32.gmra.mrb[8].mxu1 %vm99_vm0, %v96_v40 }
  0x44   :  { %3899 = vmatprep.mubr.msk.f32.mxu1 %vm4732_vm1, %v4733_v14 }
 0x102   :  { %v4943_v16 = vpop.f32.mrb[0].mxu0 }
 0x103   :  { %v190_v17 = vpop.f32.mrb[1].mxu0  ;;  %v236_v0 = vadd.f32 %v4943_v16, %v4952_v20 }
 0x104   :  { %v235_v23 = vadd.f32 %v4952_v20, %v190_v17 }
 0x106   :  { %v4945_v18 = vpop.f32.mrb[2].mxu0  ;;  %v5002_v45 = vpop.f32.mrb[0].mxu1 }
 0x107   :  { %v4947_v19 = vpop.f32.mrb[3].mxu0  ;;  %v5004_v46 = vpop.f32.mrb[1].mxu1 }
 0x10a   :  { %v4954_v21 = vpop.f32.mrb[4].mxu0  ;;  %v3870_v48 = vpop.f32.mrb[2].mxu1 }
 0x10b   :  { %v4956_v22 = vpop.f32.mrb[5].mxu0  ;;  %v5012_v49 = vadd.f32 %v3870_v48, %v5009_v47  ;;  %v311_v50 = vpop.f32.mrb[3].mxu1 }
 0x10c   :  { %v5015_v51 = vadd.f32 %v5009_v47, %v311_v50 }
 0x10e   :  { %v440_v24 = vpop.f32.mrb[6].mxu0  ;;  %v3873_v52 = vpop.f32.mrb[4].mxu1 }
 0x10f   :  { %v444_v25 = vadd.f32 %v440_v24, %v235_v23  ;;  %v3890_v26 = vpop.f32.mrb[7].mxu0  ;;  %v5018_v53 = vadd.f32 %v3873_v52, %v5009_v47  ;;  %v321_v54 = vpop.f32.mrb[5].mxu1 }
 0x110   :  { %v5021_v55 = vadd.f32 %v5009_v47, %v321_v54 }
 0x111   :  { %4481 = vtanh.f32 %v444_v25  ;;  %v3559_v29 = vmul.f32 -1.442695, %v444_v25 }
 0x112   :  { %v3876_v56 = vpop.f32.mrb[6].mxu1 }
 0x113   :  { %4483 = vpow2.f32 %v3559_v29  ;;  %v5024_v57 = vadd.f32 %v3876_v56, %v5009_v47  ;;  %v331_v58 = vpop.f32.mrb[7].mxu1 }
 0x114   :  { %v5027_v59 = vadd.f32 %v5009_v47, %v331_v58 }
 0x116   :  { %v5029_v60 = vpop.f32.mrb[8].mxu1 }
 0x117   :  { %v341_v61 = vpop.f32.mrb[9].mxu1 }
 0x118   :  { %v5032_v62 = vadd.f32 %v5009_v47, %v341_v61 }
 0x11b   :  { %v4482_v27 = vpop.eup %4481 }
 0x11c   :  { %458 = vrot.lane.b32.xlu0 %v4482_v27, %s4734_s2  ;;  %v237_v27 = vadd.f32 %v4952_v20, %v4947_v19 }
 0x11d   :  { %v4484_v30 = vpop.eup %4483 }
 0x11e   :  { %v448_v31 = vadd.f32 1.0, %v4484_v30 }
 0x120   :  { %453 = vrot.lane.b32.xlu0 %v365_v28, %s4735_s6  ;;  %4485 = vrcp.f32 %v448_v31 }
 0x12a   :  { %v4486_v32 = vpop.eup %4485 }
 0x18e   :  { %v459_v33 = vpop.permute.xlu0 %458 }
 0x18f   :  { %v461_v34 = vmul.f32 %v4486_v32, %v459_v33 }
 0x191   :  { %463 = vrot.lane.b32.xlu1 %v461_v34, %s4735_s6 }
 0x192   :  { %v454_v35 = vpop.permute.xlu0 %453 }
 0x193   :  { %v456_v36 = vmul.f32 %v4486_v32, %v454_v35 }
 0x203   :  { %v464_v37 = vpop.permute.xlu1 %463 }
 0x204   :  { %v4965_v38 = vadd.f32 %v464_v37, %v456_v36 }
 0x206   :  { %4487 = vtanh.f32 %v4965_v38 }
 0x210   :  { %v4488_v42 = vpop.eup %4487 }
 0x211   :  { %469 = vrot.lane.b32.xlu1 %v4488_v42, %s4734_s2 }
 0x283   :  { %v470_v43 = vpop.permute.xlu1 %469 }
 0x284   :  { %v472_v44 = vmul.f32 %v4486_v32, %v470_v43 }
 0x286   :  { %474 = vrot.lane.b32.xlu0 %v472_v44, %s4735_s6  ;;  %v238_v44 = vadd.f32 %v4945_v18, %v4952_v20 }
 0x2f8   :  { %v5034_v63 = vpop.permute.xlu0 %474 }
 0x2f9   :  { %3900 = vmatmul.mubr.msk.f32.vlgmr.msra.gmra.mrb[10].mxu1 %vm370_vm2, %v5034_v63 }
 0x2fa   :  { %4277 = vmatpush3.bf16.msra.mxu1 %v4891_v6  ;;  %3921 = vmatprep.mubr.msk.f32.mxu1 %vm4732_vm1, %v4733_v14 }
 0x2fb   :  { %4278 = vmatprep.subr.bf16.mxu1 %v4731_v8 }
 0x2fe   :  { %4280 = vmatpush3.bf16.msra.mxu1 %v4910_v11 }
 0x2ff   :  { %4287 = vmatprep.subr.bf16.mxu1 %v4731_v8 }
 0x3cc   :  { %v544_v1 = vpop.f32.mrb[10].mxu1 }
 0x3cd   :  { %v548_v2 = vadd.f32 %v544_v1, %v236_v0  ;;  %v3901_v3 = vpop.f32.mrb[11].mxu1 }
 0x3cf   :  { %4489 = vtanh.f32 %v548_v2  ;;  %v3561_v5 = vmul.f32 -1.442695, %v548_v2 }
 0x3d1   :  { %4491 = vpow2.f32 %v3561_v5 }
 0x3d9   :  { %v4490_v4 = vpop.eup %4489 }
 0x3da   :  { %558 = vrot.lane.b32.xlu1 %v4490_v4, %s4734_s2 }
 0x3db   :  { %v4492_v7 = vpop.eup %4491 }
 0x3dc   :  { %v552_v9 = vadd.f32 1.0, %v4492_v7 }
 0x3de   :  { %4493 = vrcp.f32 %v552_v9 }
 0x3e8   :  { %v4494_v10 = vpop.eup %4493 }
 0x3e9   :  { %v556_v15 = vmul.f32 %v4494_v10, %v4965_v38 }
 0x44c   :  { %v559_v12 = vpop.permute.xlu1 %558 }
 0x44d   :  { %v561_v13 = vmul.f32 %v4494_v10, %v559_v12  ;;  %v239_v12 = vadd.f32 %v4952_v20, %v4956_v22 }
 0x44f   :  { %563 = vrot.lane.b32.xlu0 %v561_v13, %s4735_s6 }
 0x4c1   :  { %v564_v16 = vpop.permute.xlu0 %563 }
 0x4c2   :  { %v566_v17 = vadd.f32 %v564_v16, %v556_v15 }
 0x4c4   :  { %4495 = vtanh.f32 %v566_v17 }
 0x4ce   :  { %v4496_v23 = vpop.eup %4495 }
 0x4cf   :  { %569 = vrot.lane.b32.xlu1 %v4496_v23, %s4734_s2 }
 0x541   :  { %v570_v24 = vpop.permute.xlu1 %569 }
 0x542   :  { %v572_v25 = vmul.f32 %v4494_v10, %v570_v24 }
 0x544   :  { %574 = vrot.lane.b32.xlu0 %v572_v25, %s4735_s6 }
 0x5b6   :  { %v5051_v26 = vpop.permute.xlu0 %574 }
 0x5b7   :  { %3911 = vmatmul.mubr.msk.f32.vlgmr.msra.gmra.mrb[8].mxu0 %vm370_vm2, %v5051_v26 }
 0x5b8   :  { %4283 = vmatpush3.bf16.msra.mxu0 %v4891_v6  ;;  %3932 = vmatprep.mubr.msk.f32.mxu0 %vm4732_vm1, %v4733_v14 }
 0x5b9   :  { %4284 = vmatprep.subr.bf16.mxu0 %v4731_v8 }
 0x5bc   :  { %4286 = vmatpush3.bf16.msra.mxu0 %v4910_v11 }
 0x5bd   :  { %4293 = vmatprep.subr.bf16.mxu0 %v4731_v8 }
 0x68a   :  { %v644_v28 = vpop.f32.mrb[8].mxu0 }
 0x68b   :  { %v648_v29 = vadd.f32 %v644_v28, %v237_v27  ;;  %v3912_v30 = vpop.f32.mrb[9].mxu0 }
 0x68d   :  { %4497 = vtanh.f32 %v648_v29  ;;  %v3563_v32 = vmul.f32 -1.442695, %v648_v29 }
 0x68f   :  { %4499 = vpow2.f32 %v3563_v32 }
 0x697   :  { %v4498_v31 = vpop.eup %4497 }
 0x698   :  { %658 = vrot.lane.b32.xlu1 %v4498_v31, %s4734_s2 }
 0x699   :  { %v4500_v33 = vpop.eup %4499 }
 0x69a   :  { %v652_v34 = vadd.f32 1.0, %v4500_v33 }
 0x69c   :  { %4501 = vrcp.f32 %v652_v34 }
 0x6a6   :  { %v4502_v35 = vpop.eup %4501 }
 0x6a7   :  { %v656_v38 = vmul.f32 %v4502_v35, %v566_v17 }
 0x70a   :  { %v659_v36 = vpop.permute.xlu1 %658 }
 0x70b   :  { %v661_v37 = vmul.f32 %v4502_v35, %v659_v36  ;;  %v240_v36 = vadd.f32 %v4954_v21, %v4952_v20 }
 0x70d   :  { %663 = vrot.lane.b32.xlu0 %v661_v37, %s4735_s6 }
 0x77f   :  { %v664_v39 = vpop.permute.xlu0 %663 }
 0x780   :  { %v666_v19 = vadd.f32 %v664_v39, %v656_v38 }
 0x782   :  { %4503 = vtanh.f32 %v666_v19 }
 0x78c   :  { %v4504_v40 = vpop.eup %4503 }
 0x78d   :  { %669 = vrot.lane.b32.xlu1 %v4504_v40, %s4734_s2 }
 0x7ff   :  { %v670_v41 = vpop.permute.xlu1 %669 }
 0x800   :  { %v672_v42 = vmul.f32 %v4502_v35, %v670_v41 }
 0x802   :  { %674 = vrot.lane.b32.xlu0 %v672_v42, %s4735_s6 }
 0x874   :  { %v5067_v43 = vpop.permute.xlu0 %674 }
 0x875   :  { %3922 = vmatmul.mubr.msk.f32.vlgmr.msra.gmra.mrb[12].mxu1 %vm370_vm2, %v5067_v43 }
 0x876   :  { %4289 = vmatpush3.bf16.msra.mxu1 %v4891_v6  ;;  %3943 = vmatprep.mubr.msk.f32.mxu1 %vm4732_vm1, %v4733_v14 }
 0x877   :  { %4290 = vmatprep.subr.bf16.mxu1 %v4731_v8 }
 0x87a   :  { %4292 = vmatpush3.bf16.msra.mxu1 %v4910_v11 }
 0x87b   :  { %4299 = vmatprep.subr.bf16.mxu1 %v4731_v8 }
 0x948   :  { %v744_v48 = vpop.f32.mrb[12].mxu1 }
 0x949   :  { %v748_v50 = vadd.f32 %v744_v48, %v238_v44  ;;  %v3923_v52 = vpop.f32.mrb[13].mxu1 }
 0x94b   :  { %4505 = vtanh.f32 %v748_v50  ;;  %v3565_v56 = vmul.f32 -1.442695, %v748_v50 }
 0x94d   :  { %4507 = vpow2.f32 %v3565_v56 }
 0x955   :  { %v4506_v54 = vpop.eup %4505 }
 0x956   :  { %758 = vrot.lane.b32.xlu1 %v4506_v54, %s4734_s2 }
 0x957   :  { %v4508_v58 = vpop.eup %4507 }
 0x958   :  { %v752_v61 = vadd.f32 1.0, %v4508_v58  ;;  %v1177_v58 = vld [vmem:[%s5599_s7] sm:$0xff] }
 0x95a   :  { %4509 = vrcp.f32 %v752_v61  ;;  %v1178_v61 = vld [vmem:[%s5599_s7 + $0x8] sm:$0xff] }
 0x964   :  { %v4510_v0 = vpop.eup %4509 }
 0x965   :  { %v756_v3 = vmul.f32 %v4510_v0, %v666_v19 }
 0x9c8   :  { %v759_v1 = vpop.permute.xlu1 %758 }
 0x9c9   :  { %v761_v2 = vmul.f32 %v4510_v0, %v759_v1  ;;  %v1179_v1 = vld [vmem:[%s5599_s7 + $0x10] sm:$0xff] }
 0x9cb   :  { %763 = vrot.lane.b32.xlu0 %v761_v2, %s4735_s6  ;;  %v1180_v2 = vld [vmem:[%s5599_s7 + $0x18] sm:$0xff] }
 0xa3d   :  { %v764_v4 = vpop.permute.xlu0 %763 }
 0xa3e   :  { %v766_v18 = vadd.f32 %v764_v4, %v756_v3  ;;  %v5134_v4 = vpack.c.bf16 %v1180_v2, %v1179_v1 }
 0xa40   :  { %4511 = vtanh.f32 %v766_v18 }
 0xa4a   :  { %v4512_v5 = vpop.eup %4511 }
 0xa4b   :  { %769 = vrot.lane.b32.xlu1 %v4512_v5, %s4734_s2  ;;  %v241_v5 = vadd.f32 %v4952_v20, %v5004_v46  ;;  %v3575_v46 = vld [vmem:[%s5623_s3 + $0x8] sm:$0xff] }
 0xabd   :  { %v770_v7 = vpop.permute.xlu1 %769 }
 0xabe   :  { %v772_v9 = vmul.f32 %v4510_v0, %v770_v7  ;;  %v5121_v0 = vpack.c.bf16 %v1178_v61, %v1177_v58 }
 0xac0   :  { %774 = vrot.lane.b32.xlu0 %v772_v9, %s4735_s6 }
 0xb32   :  { %v5083_v10 = vpop.permute.xlu0 %774 }
 0xb33   :  { %3933 = vmatmul.mubr.msk.f32.vlgmr.msra.gmra.mrb[10].mxu0 %vm370_vm2, %v5083_v10 }
 0xb34   :  { %4295 = vmatpush3.bf16.msra.mxu0 %v4891_v6  ;;  %3954 = vmatprep.mubr.msk.f32.mxu0 %vm4732_vm1, %v4733_v14 }
 0xb35   :  { %4296 = vmatprep.subr.bf16.mxu0 %v4731_v8 }
 0xb38   :  { %4298 = vmatpush3.bf16.msra.mxu0 %v4910_v11 }
 0xb39   :  { %4305 = vmatprep.subr.bf16.mxu0 %v4731_v8 }
 0xc06   :  { %v844_v13 = vpop.f32.mrb[10].mxu0 }
 0xc07   :  { %v848_v15 = vadd.f32 %v844_v13, %v239_v12  ;;  %v3934_v16 = vpop.f32.mrb[11].mxu0  ;;  %v363_v13 = vadd.f32 %v5029_v60, %v5009_v47 }
 0xc09   :  { %4513 = vtanh.f32 %v848_v15  ;;  %v3567_v23 = vmul.f32 -1.442695, %v848_v15 }
 0xc0b   :  { %4515 = vpow2.f32 %v3567_v23 }
 0xc13   :  { %v4514_v17 = vpop.eup %4513 }
 0xc14   :  { %858 = vrot.lane.b32.xlu1 %v4514_v17, %s4734_s2 }
 0xc15   :  { %v4516_v24 = vpop.eup %4515 }
 0xc16   :  { %v852_v25 = vadd.f32 1.0, %v4516_v24 }
 0xc18   :  { %4517 = vrcp.f32 %v852_v25 }
 0xc22   :  { %v4518_v27 = vpop.eup %4517 }
 0xc23   :  { %v856_v30 = vmul.f32 %v4518_v27, %v766_v18  ;;  %v3574_v18 = vld [vmem:[%s5622_s23 + $0x8] sm:$0xff] }
 0xc86   :  { %v859_v28 = vpop.permute.xlu1 %858 }
 0xc87   :  { %v861_v29 = vmul.f32 %v4518_v27, %v859_v28 }
 0xc89   :  { %863 = vrot.lane.b32.xlu0 %v861_v29, %s4735_s6 }
 0xcfb   :  { %v864_v31 = vpop.permute.xlu0 %863 }
 0xcfc   :  { %v866_v22 = vadd.f32 %v864_v31, %v856_v30 }
 0xcfe   :  { %4519 = vtanh.f32 %v866_v22 }
 0xd08   :  { %v4520_v32 = vpop.eup %4519 }
 0xd09   :  { %869 = vrot.lane.b32.xlu1 %v4520_v32, %s4734_s2 }
 0xd7b   :  { %v870_v33 = vpop.permute.xlu1 %869 }
 0xd7c   :  { %v872_v34 = vmul.f32 %v4518_v27, %v870_v33 }
 0xd7e   :  { %874 = vrot.lane.b32.xlu0 %v872_v34, %s4735_s6 }
 0xdf0   :  { %v5099_v35 = vpop.permute.xlu0 %874 }
 0xdf1   :  { %3944 = vmatmul.mubr.msk.f32.vlgmr.msra.gmra.mrb[14].mxu1 %vm370_vm2, %v5099_v35 }
 0xdf2   :  { %4301 = vmatpush3.bf16.msra.mxu1 %v4891_v6  ;;  %3965 = vmatprep.mubr.msk.f32.mxu1 %vm4732_vm1, %v4733_v14 }
 0xdf3   :  { %4302 = vmatprep.subr.bf16.mxu1 %v4731_v8 }
 0xdf6   :  { %4304 = vmatpush3.bf16.msra.mxu1 %v4910_v11 }
 0xdf7   :  { %4311 = vmatprep.subr.bf16.mxu1 %v4731_v8 }
 0xec4   :  { %v944_v37 = vpop.f32.mrb[14].mxu1 }
 0xec5   :  { %v948_v38 = vadd.f32 %v944_v37, %v240_v36  ;;  %v3945_v39 = vpop.f32.mrb[15].mxu1 }
 0xec7   :  { %4521 = vtanh.f32 %v948_v38  ;;  %v3569_v6 = vmul.f32 -1.442695, %v948_v38 }
 0xec9   :  { %4523 = vpow2.f32 %v3569_v6 }
 0xed1   :  { %v4522_v19 = vpop.eup %4521 }
 0xed2   :  { %958 = vrot.lane.b32.xlu1 %v4522_v19, %s4734_s2 }
 0xed3   :  { %v4524_v40 = vpop.eup %4523 }
 0xed4   :  { %v952_v41 = vadd.f32 1.0, %v4524_v40 }
 0xed6   :  { %4525 = vrcp.f32 %v952_v41 }
 0xee0   :  { %v4526_v42 = vpop.eup %4525 }
 0xee1   :  { %v956_v48 = vmul.f32 %v4526_v42, %v866_v22 }
 0xf44   :  { %v959_v44 = vpop.permute.xlu1 %958 }
 0xf45   :  { %v961_v11 = vmul.f32 %v4526_v42, %v959_v44 }
 0xf47   :  { %963 = vrot.lane.b32.xlu0 %v961_v11, %s4735_s6 }
 0xfb9   :  { %v964_v50 = vpop.permute.xlu0 %963 }
 0xfba   :  { %v966_v21 = vadd.f32 %v964_v50, %v956_v48 }
 0xfbc   :  { %4527 = vtanh.f32 %v966_v21 }
 0xfc6   :  { %v4528_v52 = vpop.eup %4527 }
 0xfc7   :  { %969 = vrot.lane.b32.xlu1 %v4528_v52, %s4734_s2 }
0x1039   :  { %v970_v54 = vpop.permute.xlu1 %969 }
0x103a   :  { %v972_v56 = vmul.f32 %v4526_v42, %v970_v54  ;;  %v242_v54 = vadd.f32 %v5002_v45, %v4952_v20 }
0x103c   :  { %974 = vrot.lane.b32.xlu0 %v972_v56, %s4735_s6 }
0x10ae   :  { %v5129_v3 = vpop.permute.xlu0 %974 }
0x10af   :  { %3955 = vmatmul.mubr.msk.f32.vlgmr.msra.gmra.mrb[12].mxu0 %vm370_vm2, %v5129_v3 }
0x10b0   :  { %4307 = vmatpush3.bf16.msra.mxu0 %v5121_v0  ;;  %3976 = vmatprep.mubr.msk.f32.mxu0 %vm4732_vm1, %v4733_v14 }
0x10b1   :  { %4308 = vmatprep.subr.bf16.mxu0 %v4731_v8 }
0x10b4   :  { %4310 = vmatpush3.bf16.msra.mxu0 %v5134_v4 }
0x10b5   :  { %4317 = vmatprep.subr.bf16.mxu0 %v4731_v8 }
0x10b7   :  { %3977 = vmatmul.mubr.msk.f32.vlgmr.msra.gmra.mrb[14].mxu0 %vm370_vm2, %v3574_v18 }
0x10b8   :  { %4319 = vmatpush3.bf16.msra.mxu0 %v5121_v0  ;;  %3998 = vmatprep.mubr.msk.f32.mxu0 %vm4732_vm1, %v4733_v14 }
0x10b9   :  { %4320 = vmatprep.subr.bf16.mxu0 %v4731_v8 }
0x10bc   :  { %4322 = vmatpush3.bf16.msra.mxu0 %v5134_v4 }
0x10bd   :  { %4329 = vmatprep.subr.bf16.mxu0 %v4731_v8 }
0x1182   :  { %v1044_v7 = vpop.f32.mrb[12].mxu0 }
0x1183   :  { %v1048_v9 = vadd.f32 %v1044_v7, %v241_v5  ;;  %v3956_v12 = vpop.f32.mrb[13].mxu0 }
0x1185   :  { %4529 = vtanh.f32 %v1048_v9  ;;  %v3571_v25 = vmul.f32 -1.442695, %v1048_v9 }
0x118a   :  { %v1250_v15 = vpop.f32.mrb[14].mxu0 }
0x118b   :  { %v1254_v16 = vadd.f32 %v1250_v15, %v363_v13  ;;  %v3978_v17 = vpop.f32.mrb[15].mxu0 }
0x118d   :  { %4531 = vtanh.f32 %v1254_v16  ;;  %v3577_v27 = vmul.f32 -1.442695, %v1254_v16 }
0x118e   :  { %4533 = vpow2.f32 %v3571_v25 }
0x118f   :  { %v4530_v23 = vpop.eup %4529  ;;  %4535 = vpow2.f32 %v3577_v27 }
0x1190   :  { %1058 = vrot.lane.b32.xlu1 %v4530_v23, %s4734_s2 }
0x1197   :  { %v4532_v24 = vpop.eup %4531 }
0x1198   :  { %1268 = vrot.lane.b32.xlu0 %v4532_v24, %s4734_s2  ;;  %v4534_v47 = vpop.eup %4533 }
0x1199   :  { %v1052_v60 = vadd.f32 1.0, %v4534_v47  ;;  %v4536_v28 = vpop.eup %4535 }
0x119a   :  { %v1258_v29 = vadd.f32 1.0, %v4536_v28 }
0x119b   :  { %4537 = vrcp.f32 %v1052_v60 }
0x119c   :  { %1263 = vrot.lane.b32.xlu0 %v3575_v46, %s4735_s6  ;;  %4539 = vrcp.f32 %v1258_v29 }
0x11a5   :  { %v4538_v30 = vpop.eup %4537 }
0x11a6   :  { %v4540_v32 = vpop.eup %4539  ;;  %v1056_v36 = vmul.f32 %v4538_v30, %v966_v21 }
0x1202   :  { %v1059_v31 = vpop.permute.xlu1 %1058 }
0x1203   :  { %v1061_v22 = vmul.f32 %v4538_v30, %v1059_v31 }
0x1205   :  { %1063 = vrot.lane.b32.xlu1 %v1061_v22, %s4735_s6 }
0x120a   :  { %v1269_v33 = vpop.permute.xlu0 %1268 }
0x120b   :  { %v1271_v34 = vmul.f32 %v4540_v32, %v1269_v33 }
0x120d   :  { %1273 = vrot.lane.b32.xlu1 %v1271_v34, %s4735_s6 }
0x120e   :  { %v1264_v39 = vpop.permute.xlu0 %1263 }
0x120f   :  { %v1266_v19 = vmul.f32 %v4540_v32, %v1264_v39 }
0x1277   :  { %v1064_v37 = vpop.permute.xlu1 %1063 }
0x1278   :  { %v5163_v38 = vadd.f32 %v1064_v37, %v1056_v36 }
0x127a   :  { %4541 = vtanh.f32 %v5163_v38 }
0x127f   :  { %v1274_v6 = vpop.permute.xlu1 %1273 }
0x1280   :  { %v1276_v40 = vadd.f32 %v1274_v6, %v1266_v19 }
0x1282   :  { %4543 = vtanh.f32 %v1276_v40 }
0x1284   :  { %v4542_v41 = vpop.eup %4541 }
0x1285   :  { %1069 = vrot.lane.b32.xlu0 %v4542_v41, %s4734_s2 }
0x128c   :  { %v4544_v42 = vpop.eup %4543 }
0x128d   :  { %1279 = vrot.lane.b32.xlu1 %v4544_v42, %s4734_s2 }
0x12f7   :  { %v1070_v44 = vpop.permute.xlu0 %1069 }
0x12f8   :  { %v1072_v11 = vmul.f32 %v4538_v30, %v1070_v44 }
0x12fa   :  { %1074 = vrot.lane.b32.xlu0 %v1072_v11, %s4735_s6 }
0x12ff   :  { %v1280_v48 = vpop.permute.xlu1 %1279 }
0x1300   :  { %v1282_v50 = vmul.f32 %v4540_v32, %v1280_v48 }
0x1302   :  { %1284 = vrot.lane.b32.xlu1 %v1282_v50, %s4735_s6 }
0x136c   :  { %v5170_v21 = vpop.permute.xlu0 %1074 }
0x136d   :  { %3966 = vmatmul.mubr.msk.f32.vlgmr.msra.gmra.mrb[16].mxu1 %vm370_vm2, %v5170_v21 }
0x136e   :  { %4313 = vmatpush3.bf16.msra.mxu1 %v5121_v0  ;;  %3987 = vmatprep.mubr.msk.f32.mxu1 %vm4732_vm1, %v4733_v14 }
0x136f   :  { %4314 = vmatprep.subr.bf16.mxu1 %v4731_v8 }
0x1372   :  { %4316 = vmatpush3.bf16.msra.mxu1 %v5134_v4 }
0x1373   :  { %4323 = vmatprep.subr.bf16.mxu1 %v4731_v8 }
0x1374   :  { %v5180_v52 = vpop.permute.xlu1 %1284 }
0x1375   :  { %3988 = vmatmul.mubr.msk.f32.vlgmr.msra.gmra.mrb[18].mxu1 %vm370_vm2, %v5180_v52 }
0x1376   :  { %4325 = vmatpush3.bf16.msra.mxu1 %v5121_v0  ;;  %4009 = vmatprep.mubr.msk.f32.mxu1 %vm4732_vm1, %v4733_v14 }
0x1377   :  { %4326 = vmatprep.subr.bf16.mxu1 %v4731_v8 }
0x137a   :  { %4328 = vmatpush3.bf16.msra.mxu1 %v5134_v4 }
0x137b   :  { %4335 = vmatprep.subr.bf16.mxu1 %v4731_v8 }
0x1440   :  { %v1144_v56 = vpop.f32.mrb[16].mxu1 }
0x1441   :  { %v5192_v58 = vadd.f32 %v1144_v56, %v242_v54  ;;  %v3967_v61 = vpop.f32.mrb[17].mxu1 }
0x1448   :  { %v1354_v1 = vpop.f32.mrb[18].mxu1 }
0x1449   :  { %v1358_v2 = vadd.f32 %v1354_v1, %v5032_v62  ;;  %v3989_v18 = vpop.f32.mrb[19].mxu1 }
0x144b   :  { %4545 = vtanh.f32 %v1358_v2  ;;  %v3579_v7 = vmul.f32 -1.442695, %v1358_v2 }
0x144d   :  { %4547 = vpow2.f32 %v3579_v7 }
0x1455   :  { %v4546_v5 = vpop.eup %4545 }
0x1456   :  { %1368 = vrot.lane.b32.xlu0 %v4546_v5, %s4734_s2 }
0x1457   :  { %v4548_v9 = vpop.eup %4547 }
0x1458   :  { %v1362_v12 = vadd.f32 1.0, %v4548_v9 }
0x145a   :  { %4549 = vrcp.f32 %v1362_v12 }
0x1464   :  { %v4550_v13 = vpop.eup %4549 }
0x1465   :  { %v1366_v45 = vmul.f32 %v4550_v13, %v1276_v40 }
0x14c8   :  { %v1369_v15 = vpop.permute.xlu0 %1368 }
0x14c9   :  { %v1371_v20 = vmul.f32 %v4550_v13, %v1369_v15 }
0x14cb   :  { %1373 = vrot.lane.b32.xlu1 %v1371_v20, %s4735_s6 }
0x153d   :  { %v1374_v16 = vpop.permute.xlu1 %1373 }
0x153e   :  { %v1376_v17 = vadd.f32 %v1374_v16, %v1366_v45 }
0x1540   :  { %4551 = vtanh.f32 %v1376_v17 }
0x154a   :  { %v4552_v62 = vpop.eup %4551 }
0x154b   :  { %1379 = vrot.lane.b32.xlu0 %v4552_v62, %s4734_s2 }
0x15bd   :  { %v1380_v23 = vpop.permute.xlu0 %1379 }
0x15be   :  { %v1382_v24 = vmul.f32 %v4550_v13, %v1380_v23 }
0x15c0   :  { %1384 = vrot.lane.b32.xlu1 %v1382_v24, %s4735_s6 }
0x1632   :  { %v5199_v46 = vpop.permute.xlu1 %1384 }
0x1633   :  { %3999 = vmatmul.mubr.msk.f32.vlgmr.msra.gmra.mrb[16].mxu0 %vm370_vm2, %v5199_v46 }
0x1634   :  { %4331 = vmatpush3.bf16.msra.mxu0 %v5121_v0  ;;  %4020 = vmatprep.mubr.msk.f32.mxu0 %vm4732_vm1, %v4733_v14 }
0x1635   :  { %4332 = vmatprep.subr.bf16.mxu0 %v4731_v8 }
0x1638   :  { %4334 = vmatpush3.bf16.msra.mxu0 %v5134_v4 }
0x1639   :  { %4341 = vmatprep.subr.bf16.mxu0 %v4731_v8 }
0x1706   :  { %v1454_v25 = vpop.f32.mrb[16].mxu0 }
0x1707   :  { %v1458_v27 = vadd.f32 %v1454_v25, %v5024_v57  ;;  %v4000_v47 = vpop.f32.mrb[17].mxu0 }
0x1709   :  { %4553 = vtanh.f32 %v1458_v27  ;;  %v3581_v28 = vmul.f32 -1.442695, %v1458_v27 }
0x170b   :  { %4555 = vpow2.f32 %v3581_v28 }
0x1713   :  { %v4554_v60 = vpop.eup %4553 }
0x1714   :  { %1468 = vrot.lane.b32.xlu0 %v4554_v60, %s4734_s2 }
0x1715   :  { %v4556_v29 = vpop.eup %4555 }
0x1716   :  { %v1462_v30 = vadd.f32 1.0, %v4556_v29 }
0x1718   :  { %4557 = vrcp.f32 %v1462_v30 }
0x1722   :  { %v4558_v31 = vpop.eup %4557 }
0x1723   :  { %v1466_v33 = vmul.f32 %v4558_v31, %v1376_v17 }
0x1786   :  { %v1469_v22 = vpop.permute.xlu0 %1468 }
0x1787   :  { %v1471_v32 = vmul.f32 %v4558_v31, %v1469_v22 }
0x1789   :  { %1473 = vrot.lane.b32.xlu1 %v1471_v32, %s4735_s6 }
0x17fb   :  { %v1474_v34 = vpop.permute.xlu1 %1473 }
0x17fc   :  { %v1476_v36 = vadd.f32 %v1474_v34, %v1466_v33 }
0x17fe   :  { %4559 = vtanh.f32 %v1476_v36 }
0x1808   :  { %v4560_v57 = vpop.eup %4559 }
0x1809   :  { %1479 = vrot.lane.b32.xlu0 %v4560_v57, %s4734_s2 }
0x187b   :  { %v1480_v37 = vpop.permute.xlu0 %1479 }
0x187c   :  { %v1482_v39 = vmul.f32 %v4558_v31, %v1480_v37 }
0x187e   :  { %1484 = vrot.lane.b32.xlu1 %v1482_v39, %s4735_s6 }
0x18f0   :  { %v5214_v19 = vpop.permute.xlu1 %1484 }
0x18f1   :  { %4010 = vmatmul.mubr.msk.f32.vlgmr.msra.gmra.mrb[20].mxu1 %vm370_vm2, %v5214_v19 }
0x18f2   :  { %4337 = vmatpush3.bf16.msra.mxu1 %v5121_v0  ;;  %4031 = vmatprep.mubr.msk.f32.mxu1 %vm4732_vm1, %v4733_v14 }
0x18f3   :  { %4338 = vmatprep.subr.bf16.mxu1 %v4731_v8 }
0x18f6   :  { %4340 = vmatpush3.bf16.msra.mxu1 %v5134_v4 }
0x18f7   :  { %4347 = vmatprep.subr.bf16.mxu1 %v4731_v8 }
0x19c4   :  { %v1554_v6 = vpop.f32.mrb[20].mxu1 }
0x19c5   :  { %v1558_v40 = vadd.f32 %v1554_v6, %v5027_v59  ;;  %v4011_v41 = vpop.f32.mrb[21].mxu1  ;;  %v1985_v6 = vld [vmem:[%s5609_s17 + $0x8] sm:$0xff] }
0x19c7   :  { %4561 = vtanh.f32 %v1558_v40  ;;  %v3583_v44 = vmul.f32 -1.442695, %v1558_v40 }
0x19c9   :  { %4563 = vpow2.f32 %v3583_v44 }
0x19d1   :  { %v4562_v42 = vpop.eup %4561 }
0x19d2   :  { %1568 = vrot.lane.b32.xlu0 %v4562_v42, %s4734_s2 }
0x19d3   :  { %v4564_v11 = vpop.eup %4563 }
0x19d4   :  { %v1562_v48 = vadd.f32 1.0, %v4564_v11  ;;  %v1986_v11 = vld [vmem:[%s5609_s17 + $0x10] sm:$0xff] }
0x19d6   :  { %4565 = vrcp.f32 %v1562_v48  ;;  %v1987_v48 = vld [vmem:[%s5609_s17 + $0x18] sm:$0xff] }
0x19e0   :  { %v4566_v50 = vpop.eup %4565 }
0x19e1   :  { %v1566_v61 = vmul.f32 %v4566_v50, %v1476_v36 }
0x1a44   :  { %v1569_v54 = vpop.permute.xlu0 %1568 }
0x1a45   :  { %v1571_v56 = vmul.f32 %v4566_v50, %v1569_v54 }
0x1a47   :  { %1573 = vrot.lane.b32.xlu1 %v1571_v56, %s4735_s6 }
0x1ab9   :  { %v1574_v1 = vpop.permute.xlu1 %1573 }
0x1aba   :  { %v1576_v2 = vadd.f32 %v1574_v1, %v1566_v61 }
0x1abc   :  { %4567 = vtanh.f32 %v1576_v2 }
0x1ac6   :  { %v4568_v59 = vpop.eup %4567 }
0x1ac7   :  { %1579 = vrot.lane.b32.xlu0 %v4568_v59, %s4734_s2 }
0x1b39   :  { %v1580_v18 = vpop.permute.xlu0 %1579 }
0x1b3a   :  { %v1582_v5 = vmul.f32 %v4566_v50, %v1580_v18  ;;  %v4357_v50 = vpack.c.bf16 %v1987_v48, %v1986_v11 }
0x1b3c   :  { %1584 = vrot.lane.b32.xlu1 %v1582_v5, %s4735_s6 }
0x1bae   :  { %v5229_v7 = vpop.permute.xlu1 %1584 }
0x1baf   :  { %4021 = vmatmul.mubr.msk.f32.vlgmr.msra.gmra.mrb[18].mxu0 %vm370_vm2, %v5229_v7 }
0x1bb0   :  { %4343 = vmatpush3.bf16.msra.mxu0 %v5121_v0  ;;  %4042 = vmatprep.mubr.msk.f32.mxu0 %vm4732_vm1, %v4733_v14 }
0x1bb1   :  { %4344 = vmatprep.subr.bf16.mxu0 %v4731_v8 }
0x1bb4   :  { %4346 = vmatpush3.bf16.msra.mxu0 %v5134_v4 }
0x1c82   :  { %v1654_v9 = vpop.f32.mrb[18].mxu0 }
0x1c83   :  { %v1658_v12 = vadd.f32 %v1654_v9, %v5018_v53  ;;  %v4022_v13 = vpop.f32.mrb[19].mxu0 }
0x1c85   :  { %4569 = vtanh.f32 %v1658_v12  ;;  %v3585_v20 = vmul.f32 -1.442695, %v1658_v12 }
0x1c87   :  { %4571 = vpow2.f32 %v3585_v20 }
0x1c8f   :  { %v4570_v15 = vpop.eup %4569 }
0x1c90   :  { %1668 = vrot.lane.b32.xlu0 %v4570_v15, %s4734_s2 }
0x1c91   :  { %v4572_v45 = vpop.eup %4571 }
0x1c92   :  { %v1662_v16 = vadd.f32 1.0, %v4572_v45 }
0x1c94   :  { %4573 = vrcp.f32 %v1662_v16  ;;  %v2236_v16 = vld [vmem:[%s5607_s15 + $0x8] sm:$0xff] }
0x1c9e   :  { %v4574_v17 = vpop.eup %4573 }
0x1c9f   :  { %v1666_v24 = vmul.f32 %v4574_v17, %v1576_v2 }
0x1d02   :  { %v1669_v62 = vpop.permute.xlu0 %1668 }
0x1d03   :  { %v1671_v23 = vmul.f32 %v4574_v17, %v1669_v62 }
0x1d05   :  { %1673 = vrot.lane.b32.xlu1 %v1671_v23, %s4735_s6 }
0x1d77   :  { %v1674_v25 = vpop.permute.xlu1 %1673 }
0x1d78   :  { %v1676_v27 = vadd.f32 %v1674_v25, %v1666_v24  ;;  %v3573_v24 = vmul.f32 -1.442695, %v5192_v58 }
0x1d7a   :  { %4575 = vtanh.f32 %v1676_v27 }
0x1d84   :  { %v4576_v53 = vpop.eup %4575 }
0x1d85   :  { %1679 = vrot.lane.b32.xlu0 %v4576_v53, %s4734_s2 }
0x1df7   :  { %v1680_v47 = vpop.permute.xlu0 %1679 }
0x1df8   :  { %v1682_v60 = vmul.f32 %v4574_v17, %v1680_v47 }
0x1dfa   :  { %1684 = vrot.lane.b32.xlu1 %v1682_v60, %s4735_s6 }
0x1e6c   :  { %v5243_v28 = vpop.permute.xlu1 %1684 }
0x1e6d   :  { %4032 = vmatmul.mubr.msk.f32.vlgmr.msra.gmra.mrb[22].mxu1 %vm370_vm2, %v5243_v28 }
0x1e6e   :  { %4349 = vmatpush3.bf16.msra.mxu1 %v5121_v0  ;;  %4053 = vmatprep.mubr.msk.f32.mxu1 %vm4732_vm1, %v4733_v14 }
0x1e6f   :  { %4350 = vmatprep.subr.bf16.mxu1 %v4731_v8 }
0x1e72   :  { %4352 = vmatpush3.bf16.msra.mxu1 %v5134_v4 }
0x1f40   :  { %v1754_v29 = vpop.f32.mrb[22].mxu1 }
0x1f41   :  { %v1758_v30 = vadd.f32 %v1754_v29, %v5021_v55  ;;  %v4033_v31 = vpop.f32.mrb[23].mxu1  ;;  %v1984_v55 = vld [vmem:[%s5609_s17] sm:$0xff]  ;;  %s5624_s17 = sld [smem:[#allocation10_spill]] }
0x1f42   :  { %v4353_v40 = vpack.c.bf16 %v1985_v6, %v1984_v55  ;;  %v2237_v31 = vld [vmem:[%s5607_s15 + $0x10] sm:$0xff] }
0x1f43   :  { %4577 = vtanh.f32 %v1758_v30  ;;  %v3587_v32 = vmul.f32 -1.442695, %v1758_v30 }
0x1f44   :  { %4354 = vmatprep.subr.bf16.mxu0 %v4353_v40 }
0x1f45   :  { %4579 = vpow2.f32 %v3587_v32 }
0x1f4d   :  { %v4578_v22 = vpop.eup %4577 }
0x1f4e   :  { %1768 = vrot.lane.b32.xlu0 %v4578_v22, %s4734_s2 }
0x1f4f   :  { %v4580_v33 = vpop.eup %4579 }
0x1f50   :  { %v1762_v34 = vadd.f32 1.0, %v4580_v33 }
0x1f52   :  { %4581 = vrcp.f32 %v1762_v34 }
0x1f5c   :  { %v4582_v0 = vpop.eup %4581 }
0x1f5d   :  { %v1766_v37 = vmul.f32 %v4582_v0, %v1676_v27 }
0x1fc0   :  { %v1769_v36 = vpop.permute.xlu0 %1768 }
0x1fc1   :  { %v1771_v57 = vmul.f32 %v4582_v0, %v1769_v36 }
0x1fc3   :  { %1773 = vrot.lane.b32.xlu1 %v1771_v57, %s4735_s6 }
0x2035   :  { %v1774_v4 = vpop.permute.xlu1 %1773 }
0x2036   :  { %v1776_v39 = vadd.f32 %v1774_v4, %v1766_v37 }
0x2038   :  { %4583 = vtanh.f32 %v1776_v39 }
0x2042   :  { %v4584_v41 = vpop.eup %4583 }
0x2043   :  { %1779 = vrot.lane.b32.xlu0 %v4584_v41, %s4734_s2 }
0x20b5   :  { %v1780_v42 = vpop.permute.xlu0 %1779 }
0x20b6   :  { %v1782_v44 = vmul.f32 %v4582_v0, %v1780_v42 }
0x20b8   :  { %1784 = vrot.lane.b32.xlu1 %v1782_v44, %s4735_s6 }
0x212a   :  { %v5269_v54 = vpop.permute.xlu1 %1784 }
0x212b   :  { %4043 = vmatmul.mubr.msk.f32.vlgmr.msra.gmra.mrb[20].mxu0 %vm370_vm2, %v5269_v54 }
0x212c   :  { %4356 = vmatpush3.bf16.msra.mxu0 %v4353_v40  ;;  %4064 = vmatprep.mubr.msk.f32.mxu0 %vm370_vm2, %v5034_v63 }
0x212d   :  { %4358 = vmatprep.subr.bf16.mxu0 %v4357_v50 }
0x2130   :  { %4360 = vmatpush3.bf16.msra.mxu0 %v4357_v50 }
0x2133   :  { %4065 = vmatmul.mubr.msk.f32.vlgmr.msra.gmra.mrb[22].mxu0 %vm370_vm2, %v5051_v26 }
0x2134   :  { %4067 = vmatprep.mubr.msk.f32.mxu0 %vm370_vm2, %v5067_v43 }
0x2137   :  { %4068 = vmatmul.mubr.msk.f32.gmra.mrb[24].mxu0 %vm370_vm2, %v5083_v10 }
0x2138   :  { %4070 = vmatprep.mubr.msk.f32.mxu0 %vm370_vm2, %v5099_v35 }
0x213b   :  { %4071 = vmatmul.mubr.msk.f32.gmra.mrb[26].mxu0 %vm370_vm2, %v5129_v3 }
0x213c   :  { %4073 = vmatprep.mubr.msk.f32.mxu0 %vm370_vm2, %v5170_v21 }
0x21fe   :  { %v1854_v56 = vpop.f32.mrb[20].mxu0 }
0x21ff   :  { %v1858_v61 = vadd.f32 %v1854_v56, %v5012_v49  ;;  %v4044_v1 = vpop.f32.mrb[21].mxu0  ;;  %v2235_v49 = vld [vmem:[%s5607_s15] sm:$0xff] }
0x2200   :  { %v4369_v17 = vpack.c.bf16 %v2236_v16, %v2235_v49  ;;  %v2112_v56 = vld [vmem:[%s5610_s18] sm:$0xff]  ;;  %v2114_v1 = vld [vmem:[%s5610_s18 + $0x10] sm:$0xff] }
0x2201   :  { %4585 = vtanh.f32 %v1858_v61  ;;  %v3589_v59 = vmul.f32 -1.442695, %v1858_v61  ;;  %v2113_v61 = vld [vmem:[%s5610_s18 + $0x8] sm:$0xff] }
0x2202   :  { %4370 = vmatprep.subr.bf16.mxu1 %v4369_v17 }
0x2203   :  { %4587 = vpow2.f32 %v3589_v59  ;;  %v2115_v59 = vld [vmem:[%s5610_s18 + $0x18] sm:$0xff] }
0x220b   :  { %v4586_v2 = vpop.eup %4585 }
0x220c   :  { %1868 = vrot.lane.b32.xlu0 %v4586_v2, %s4734_s2  ;;  %v4361_v2 = vpack.c.bf16 %v2113_v61, %v2112_v56 }
0x220d   :  { %v4588_v18 = vpop.eup %4587 }
0x220e   :  { %v1862_v5 = vadd.f32 1.0, %v4588_v18  ;;  %v2344_v18 = vld [vmem:[%s5608_s16] sm:$0xff]  ;;  %4362 = vmatprep.subr.bf16.mxu0 %v4361_v2 }
0x220f   :  { %4364 = vmatpush3.bf16.msra.mxu0 %v4361_v2 }
0x2210   :  { %4589 = vrcp.f32 %v1862_v5  ;;  %v2345_v5 = vld [vmem:[%s5608_s16 + $0x8] sm:$0xff] }
0x221a   :  { %v4590_v9 = vpop.eup %4589 }
0x221b   :  { %v1866_v15 = vmul.f32 %v4590_v9, %v1776_v39 }
0x227e   :  { %v1869_v12 = vpop.permute.xlu0 %1868 }
0x227f   :  { %v1871_v13 = vmul.f32 %v4590_v9, %v1869_v12  ;;  %v4377_v12 = vpack.c.bf16 %v2345_v5, %v2344_v18 }
0x2281   :  { %1873 = vrot.lane.b32.xlu1 %v1871_v13, %s4735_s6  ;;  %v2346_v13 = vld [vmem:[%s5608_s16 + $0x10] sm:$0xff] }
0x22f3   :  { %v1874_v20 = vpop.permute.xlu1 %1873 }
0x22f4   :  { %v5290_v45 = vadd.f32 %v1874_v20, %v1866_v15  ;;  %v2347_v15 = vld [vmem:[%s5608_s16 + $0x18] sm:$0xff] }
0x22f5   :  { %v4381_v20 = vpack.c.bf16 %v2347_v15, %v2346_v13 }
0x22f6   :  { %4591 = vtanh.f32 %v5290_v45 }
0x22f7   :  { %4593 = vtanh.f32 %v5192_v58  ;;  %v2238_v58 = vld [vmem:[%s5607_s15 + $0x18] sm:$0xff] }
0x22f8   :  { %4595 = vpow2.f32 %v3573_v24  ;;  %v4373_v22 = vpack.c.bf16 %v2238_v58, %v2237_v31 }
0x2300   :  { %v4592_v62 = vpop.eup %4591 }
0x2301   :  { %1879 = vrot.lane.b32.xlu0 %v4592_v62, %s4734_s2  ;;  %v4594_v23 = vpop.eup %4593  ;;  %v2451_v62 = vld [vmem:[%s5606_s14] sm:$0xff] }
0x2302   :  { %v4596_v25 = vpop.eup %4595 }
0x2303   :  { %v1152_v27 = vadd.f32 1.0, %v4596_v25 }
0x2305   :  { %1158 = vrot.lane.b32.xlu0 %v4594_v23, %s4734_s2  ;;  %4597 = vrcp.f32 %v1152_v27  ;;  %v2452_v23 = vld [vmem:[%s5606_s14 + $0x8] sm:$0xff]  ;;  %v2453_v27 = vld [vmem:[%s5606_s14 + $0x10] sm:$0xff] }
0x2306   :  { %v5376_v25 = vpack.c.bf16 %v2452_v23, %v2451_v62 }
0x230f   :  { %v4598_v60 = vpop.eup %4597 }
0x2310   :  { %v1156_v33 = vmul.f32 %v4598_v60, %v5163_v38 }
0x2373   :  { %v1880_v53 = vpop.permute.xlu0 %1879 }
0x2374   :  { %v1882_v47 = vmul.f32 %v4590_v9, %v1880_v53  ;;  %v4365_v9 = vpack.c.bf16 %v2115_v59, %v2114_v1  ;;  %v2454_v53 = vld [vmem:[%s5606_s14 + $0x18] sm:$0xff] }
0x2376   :  { %1884 = vrot.lane.b32.xlu1 %v1882_v47, %s4735_s6  ;;  %4366 = vmatprep.subr.bf16.mxu0 %v4365_v9  ;;  %v5395_v47 = vpack.c.bf16 %v2454_v53, %v2453_v27 }
0x2377   :  { %v1159_v29 = vpop.permute.xlu0 %1158  ;;  %4368 = vmatpush3.bf16.msra.mxu0 %v4365_v9 }
0x2378   :  { %v1161_v30 = vmul.f32 %v4598_v60, %v1159_v29  ;;  %4385 = vmatprep.subr.bf16.mxu0 %v4731_v8 }
0x237a   :  { %1163 = vrot.lane.b32.xlu0 %v1161_v30, %s4735_s6 }
0x23e8   :  { %v5311_v32 = vpop.permute.xlu1 %1884 }
0x23e9   :  { %4054 = vmatmul.mubr.msk.f32.vlgmr.msra.gmra.mrb[24].mxu1 %vm370_vm2, %v5311_v32 }
0x23ea   :  { %4372 = vmatpush3.bf16.msra.mxu1 %v4369_v17  ;;  %4104 = vmatprep.mubr.msk.f32.mxu1 %vm370_vm2, %v5034_v63  ;;  %v3627_v17 = vld [vmem:[%s5623_s3 + $0x10] sm:$0xff] }
0x23eb   :  { %4374 = vmatprep.subr.bf16.mxu1 %v4373_v22 }
0x23ec   :  { %v1164_v34 = vpop.permute.xlu0 %1163 }
0x23ed   :  { %v1166_v0 = vadd.f32 %v1164_v34, %v1156_v33 }
0x23ee   :  { %4376 = vmatpush3.bf16.msra.mxu1 %v4373_v22 }
0x23ef   :  { %4599 = vtanh.f32 %v1166_v0  ;;  %4378 = vmatprep.subr.bf16.mxu1 %v4377_v12 }
0x23f1   :  { %4105 = vmatmul.mubr.msk.f32.vlgmr.msra.gmra.mrb[26].mxu1 %vm370_vm2, %v5051_v26 }
0x23f2   :  { %4107 = vmatprep.mubr.msk.f32.mxu1 %vm370_vm2, %v5067_v43  ;;  %4380 = vmatpush3.bf16.msra.mxu1 %v4377_v12 }
0x23f3   :  { %4382 = vmatprep.subr.bf16.mxu1 %v4381_v20 }
0x23f5   :  { %4108 = vmatmul.mubr.msk.f32.gmra.mrb[28].mxu1 %vm370_vm2, %v5083_v10 }
0x23f6   :  { %4110 = vmatprep.mubr.msk.f32.mxu1 %vm370_vm2, %v5099_v35  ;;  %4384 = vmatpush3.bf16.msra.mxu1 %v4381_v20 }
0x23f7   :  { %4391 = vmatprep.subr.bf16.mxu1 %v4731_v8 }
0x23f9   :  { %v4600_v63 = vpop.eup %4599  ;;  %4111 = vmatmul.mubr.msk.f32.gmra.mrb[30].mxu1 %vm370_vm2, %v5129_v3 }
0x23fa   :  { %4113 = vmatprep.mubr.msk.f32.mxu1 %vm370_vm2, %v5170_v21  ;;  %1169 = vrot.lane.b32.xlu0 %v4600_v63, %s4734_s2 }
0x246c   :  { %v1170_v38 = vpop.permute.xlu0 %1169 }
0x246d   :  { %v1172_v26 = vmul.f32 %v4598_v60, %v1170_v38 }
0x246f   :  { %1989 = vrot.lane.b32.xlu0 %v1172_v26, %s4735_s6 }
0x24bc   :  { %v1954_v43 = vpop.f32.mrb[24].mxu1 }
0x24bd   :  { %v1958_v36 = vadd.f32 %v1954_v43, %v5015_v51  ;;  %v4055_v10 = vpop.f32.mrb[25].mxu1 }
0x24bf   :  { %4601 = vtanh.f32 %v1958_v36  ;;  %v3591_v6 = vmul.f32 -1.442695, %v1958_v36 }
0x24c1   :  { %4603 = vpow2.f32 %v3591_v6 }
0x24c4   :  { %v4106_v57 = vpop.f32.mrb[26].mxu1 }
0x24c5   :  { %v2305_v35 = vpop.f32.mrb[27].mxu1 }
0x24c8   :  { %v4109_v37 = vpop.f32.mrb[28].mxu1 }
0x24c9   :  { %v4602_v4 = vpop.eup %4601  ;;  %v2313_v39 = vpop.f32.mrb[29].mxu1 }
0x24ca   :  { %1968 = vrot.lane.b32.xlu1 %v4602_v4, %s4734_s2 }
0x24cb   :  { %v4604_v40 = vpop.eup %4603 }
0x24cc   :  { %v4112_v3 = vpop.f32.mrb[30].mxu1  ;;  %v1962_v51 = vadd.f32 1.0, %v4604_v40 }
0x24cd   :  { %v2321_v21 = vpop.f32.mrb[31].mxu1 }
0x24ce   :  { %4605 = vrcp.f32 %v1962_v51 }
0x24d8   :  { %v4606_v41 = vpop.eup %4605 }
0x24d9   :  { %v1966_v11 = vmul.f32 %v4606_v41, %v5290_v45 }
0x24e1   :  { %v1990_v55 = vpop.permute.xlu0 %1989 }
0x24e2   :  { %4074 = vmatmul.mubr.msk.f32.gmra.mrb[28].mxu0 %vm370_vm2, %v1990_v55  ;;  %4114 = vmatmul.mubr.msk.f32.gmra.mrb[32].mxu1 %vm370_vm2, %v1990_v55 }
0x253c   :  { %v1969_v42 = vpop.permute.xlu1 %1968 }
0x253d   :  { %v1971_v44 = vmul.f32 %v4606_v41, %v1969_v42 }
0x253f   :  { %1973 = vrot.lane.b32.xlu1 %v1971_v44, %s4735_s6 }
0x25b1   :  { %v1974_v48 = vpop.permute.xlu1 %1973 }
0x25b2   :  { %v1976_v50 = vadd.f32 %v1974_v48, %v1966_v11 }
0x25b4   :  { %4607 = vtanh.f32 %v1976_v50 }
0x25be   :  { %v4608_v45 = vpop.eup %4607 }
0x25bf   :  { %1979 = vrot.lane.b32.xlu1 %v4608_v45, %s4734_s2 }
0x2631   :  { %v1980_v49 = vpop.permute.xlu1 %1979 }
0x2632   :  { %v1982_v16 = vmul.f32 %v4606_v41, %v1980_v49 }
0x2634   :  { %2117 = vrot.lane.b32.xlu1 %v1982_v16, %s4735_s6 }
0x2638   :  { %2537 = vrot.lane.b32.xlu1 %v3627_v17, %s4735_s6 }
0x26a6   :  { %v2118_v24 = vpop.permute.xlu1 %2117 }
0x26a7   :  { %4084 = vmatprep.mubr.msk.f32.mxu0 %vm370_vm2, %v2118_v24  ;;  %4124 = vmatprep.mubr.msk.f32.mxu1 %vm370_vm2, %v2118_v24 }
0x26a8   :  { %4085 = vmatmul.mubr.msk.f32.vlgmr.msra.gmra.mrb[22].mxu0 %vm370_vm2, %v5311_v32  ;;  %4125 = vmatmul.mubr.msk.f32.vlgmr.msra.gmra.mrb[34].mxu1 %vm370_vm2, %v5311_v32 }
0x26a9   :  { %4087 = vmatprep.mubr.msk.f32.mxu0 %vm370_vm2, %v5269_v54  ;;  %4127 = vmatprep.mubr.msk.f32.mxu1 %vm370_vm2, %v5269_v54 }
0x26aa   :  { %4387 = vmatpush3.bf16.msra.mxu0 %v5376_v25  ;;  %4393 = vmatpush3.bf16.msra.mxu1 %v5376_v25  ;;  %v2538_v42 = vpop.permute.xlu1 %2537 }
0x26ab   :  { %4388 = vmatprep.subr.bf16.mxu0 %v4731_v8  ;;  %4394 = vmatprep.subr.bf16.mxu1 %v4731_v8 }
0x26ac   :  { %4088 = vmatmul.mubr.msk.f32.gmra.mrb[24].mxu0 %vm370_vm2, %v5243_v28  ;;  %4128 = vmatmul.mubr.msk.f32.gmra.mrb[36].mxu1 %vm370_vm2, %v5243_v28 }
0x26ad   :  { %4090 = vmatprep.mubr.msk.f32.mxu0 %vm370_vm2, %v5229_v7  ;;  %4130 = vmatprep.mubr.msk.f32.mxu1 %vm370_vm2, %v5229_v7  ;;  %v3626_v7 = vld [vmem:[%s5622_s23 + $0x10] sm:$0xff] }
0x26ae   :  { %4390 = vmatpush3.bf16.msra.mxu0 %v5395_v47  ;;  %4396 = vmatpush3.bf16.msra.mxu1 %v5395_v47 }
0x26af   :  { %4397 = vmatprep.subr.bf16.mxu0 %v4731_v8  ;;  %4403 = vmatprep.subr.bf16.mxu1 %v4731_v8 }
0x26b0   :  { %4091 = vmatmul.mubr.msk.f32.gmra.mrb[26].mxu0 %vm370_vm2, %v5214_v19  ;;  %4131 = vmatmul.mubr.msk.f32.gmra.mrb[38].mxu1 %vm370_vm2, %v5214_v19 }
0x26b1   :  { %4093 = vmatprep.mubr.msk.f32.mxu0 %vm370_vm2, %v5199_v46  ;;  %4133 = vmatprep.mubr.msk.f32.mxu1 %vm370_vm2, %v5199_v46 }
0x26b4   :  { %4094 = vmatmul.mubr.msk.f32.gmra.mrb[28].mxu0 %vm370_vm2, %v5180_v52  ;;  %4134 = vmatmul.mubr.msk.f32.gmra.mrb[32].mxu1 %vm370_vm2, %v5180_v52  ;;  %v3600_v52 = vld [vmem:[#allocation4] ss:$0 sm:$0xff] }
0x26b5   :  { %4144 = vmatprep.mubr.msk.f32.mxu0 %vm4732_vm1, %v4733_v14  ;;  %4155 = vmatprep.mubr.msk.f32.mxu1 %vm4732_vm1, %v4733_v14 }
0x26b8   :  { %4145 = vmatmul.mubr.msk.f32.vlgmr.msra.gmra.mrb[30].mxu0 %vm370_vm2, %v3626_v7 }
0x26b9   :  { %4399 = vmatpush3.bf16.msra.mxu0 %v5376_v25  ;;  %4166 = vmatprep.mubr.msk.f32.mxu0 %vm4732_vm1, %v4733_v14 }
0x26ba   :  { %4400 = vmatprep.subr.bf16.mxu0 %v4731_v8 }
0x26bd   :  { %4402 = vmatpush3.bf16.msra.mxu0 %v5395_v47 }
0x26be   :  { %4409 = vmatprep.subr.bf16.mxu0 %v4731_v8 }
0x277b   :  { %v4086_v46 = vpop.f32.mrb[22].mxu0  ;;  %v4126_v19 = vpop.f32.mrb[34].mxu1 }
0x277c   :  { %v4453_v28 = vadd.f32 %v4086_v46, %v3600_v52  ;;  %v2187_v54 = vpop.f32.mrb[23].mxu0  ;;  %v2414_v60 = vpop.f32.mrb[35].mxu1 }
0x277d   :  { %v4454_v35 = vadd.f32 %v3600_v52, %v2187_v54 }
0x277f   :  { %v4089_v29 = vpop.f32.mrb[24].mxu0  ;;  %v4129_v30 = vpop.f32.mrb[36].mxu1 }
0x2780   :  { %v5438_v31 = vadd.f32 %v4089_v29, %v3600_v52  ;;  %v2197_v58 = vpop.f32.mrb[25].mxu0  ;;  %v2422_v22 = vpop.f32.mrb[37].mxu1 }
0x2781   :  { %v5440_v32 = vadd.f32 %v3600_v52, %v2197_v58 }
0x2783   :  { %v4092_v33 = vpop.f32.mrb[26].mxu0  ;;  %v4132_v34 = vpop.f32.mrb[38].mxu1 }
0x2784   :  { %v5442_v0 = vadd.f32 %v4092_v33, %v3600_v52  ;;  %v2207_v63 = vpop.f32.mrb[27].mxu0  ;;  %v2430_v38 = vpop.f32.mrb[39].mxu1 }
0x2785   :  { %v5444_v26 = vadd.f32 %v3600_v52, %v2207_v63 }
0x2787   :  { %v4095_v43 = vpop.f32.mrb[28].mxu0 }
0x2788   :  { %v5446_v36 = vadd.f32 %v4095_v43, %v3600_v52  ;;  %v2217_v10 = vpop.f32.mrb[29].mxu0 }
0x2789   :  { %v5448_v57 = vadd.f32 %v3600_v52, %v2217_v10 }
0x278b   :  { %v2524_v37 = vpop.f32.mrb[30].mxu0 }
0x278c   :  { %v2528_v4 = vadd.f32 %v4454_v35, %v2524_v37  ;;  %v4146_v39 = vpop.f32.mrb[31].mxu0 }
0x278e   :  { %4609 = vtanh.f32 %v2528_v4  ;;  %v3629_v21 = vmul.f32 -1.442695, %v2528_v4 }
0x2790   :  { %4611 = vpow2.f32 %v3629_v21 }
0x2798   :  { %v4610_v3 = vpop.eup %4609 }
0x2799   :  { %2542 = vrot.lane.b32.xlu0 %v4610_v3, %s4734_s2 }
0x279a   :  { %v4612_v55 = vpop.eup %4611 }
0x279b   :  { %v2532_v6 = vadd.f32 1.0, %v4612_v55 }
0x279d   :  { %4613 = vrcp.f32 %v2532_v6 }
0x27a7   :  { %v4614_v40 = vpop.eup %4613 }
0x27a8   :  { %v2540_v44 = vmul.f32 %v4614_v40, %v2538_v42 }
0x280b   :  { %v2543_v51 = vpop.permute.xlu0 %2542 }
0x280c   :  { %v2545_v41 = vmul.f32 %v4614_v40, %v2543_v51 }
0x280e   :  { %2547 = vrot.lane.b32.xlu0 %v2545_v41, %s4735_s6 }
0x2880   :  { %v2548_v11 = vpop.permute.xlu0 %2547 }
0x2881   :  { %v2550_v48 = vadd.f32 %v2548_v11, %v2540_v44 }
0x2883   :  { %4615 = vtanh.f32 %v2550_v48 }
0x288d   :  { %v4616_v50 = vpop.eup %4615 }
0x288e   :  { %2553 = vrot.lane.b32.xlu1 %v4616_v50, %s4734_s2 }
0x2900   :  { %v2554_v56 = vpop.permute.xlu1 %2553 }
0x2901   :  { %v2556_v61 = vmul.f32 %v4614_v40, %v2554_v56 }
0x2903   :  { %2558 = vrot.lane.b32.xlu0 %v2556_v61, %s4735_s6 }
0x2975   :  { %v2559_v1 = vpop.permute.xlu0 %2558 }
0x2976   :  { %4156 = vmatmul.mubr.msk.f32.vlgmr.msra.gmra.mrb[40].mxu1 %vm370_vm2, %v2559_v1 }
0x2977   :  { %4405 = vmatpush3.bf16.msra.mxu1 %v5376_v25  ;;  %4177 = vmatprep.mubr.msk.f32.mxu1 %vm4732_vm1, %v4733_v14 }
0x2978   :  { %4406 = vmatprep.subr.bf16.mxu1 %v4731_v8 }
0x297b   :  { %4408 = vmatpush3.bf16.msra.mxu1 %v5395_v47 }
0x297c   :  { %4415 = vmatprep.subr.bf16.mxu1 %v4731_v8 }
0x2a49   :  { %v2628_v2 = vpop.f32.mrb[40].mxu1 }
0x2a4a   :  { %v2632_v59 = vadd.f32 %v4453_v28, %v2628_v2  ;;  %v4157_v18 = vpop.f32.mrb[41].mxu1 }
0x2a4c   :  { %4617 = vtanh.f32 %v2632_v59  ;;  %v3631_v9 = vmul.f32 -1.442695, %v2632_v59 }
0x2a4e   :  { %4619 = vpow2.f32 %v3631_v9 }
0x2a56   :  { %v4618_v5 = vpop.eup %4617 }
0x2a57   :  { %2642 = vrot.lane.b32.xlu1 %v4618_v5, %s4734_s2 }
0x2a58   :  { %v4620_v12 = vpop.eup %4619 }
0x2a59   :  { %v2636_v13 = vadd.f32 1.0, %v4620_v12 }
0x2a5b   :  { %4621 = vrcp.f32 %v2636_v13 }
0x2a65   :  { %v4622_v15 = vpop.eup %4621 }
0x2a66   :  { %v2640_v49 = vmul.f32 %v4622_v15, %v2550_v48 }
0x2ac9   :  { %v2643_v20 = vpop.permute.xlu1 %2642 }
0x2aca   :  { %v2645_v45 = vmul.f32 %v4622_v15, %v2643_v20 }
0x2acc   :  { %2647 = vrot.lane.b32.xlu0 %v2645_v45, %s4735_s6 }
0x2b3e   :  { %v2648_v16 = vpop.permute.xlu0 %2647 }
0x2b3f   :  { %v2650_v17 = vadd.f32 %v2648_v16, %v2640_v49 }
0x2b41   :  { %4623 = vtanh.f32 %v2650_v17 }
0x2b4b   :  { %v4624_v62 = vpop.eup %4623 }
0x2b4c   :  { %2653 = vrot.lane.b32.xlu1 %v4624_v62, %s4734_s2 }
0x2bbe   :  { %v2654_v23 = vpop.permute.xlu1 %2653 }
0x2bbf   :  { %v2656_v24 = vmul.f32 %v4622_v15, %v2654_v23 }
0x2bc1   :  { %2658 = vrot.lane.b32.xlu0 %v2656_v24, %s4735_s6 }
0x2c33   :  { %v2659_v27 = vpop.permute.xlu0 %2658 }
0x2c34   :  { %4167 = vmatmul.mubr.msk.f32.vlgmr.msra.gmra.mrb[32].mxu0 %vm370_vm2, %v2659_v27 }
0x2c35   :  { %4411 = vmatpush3.bf16.msra.mxu0 %v5376_v25  ;;  %4188 = vmatprep.mubr.msk.f32.mxu0 %vm4732_vm1, %v4733_v14 }
0x2c36   :  { %4412 = vmatprep.subr.bf16.mxu0 %v4731_v8 }
0x2c39   :  { %4414 = vmatpush3.bf16.msra.mxu0 %v5395_v47 }
0x2c3a   :  { %4421 = vmatprep.subr.bf16.mxu0 %v4731_v8 }
0x2d07   :  { %v2728_v53 = vpop.f32.mrb[32].mxu0 }
0x2d08   :  { %v2732_v7 = vadd.f32 %v5440_v32, %v2728_v53  ;;  %v4168_v52 = vpop.f32.mrb[33].mxu0 }
0x2d0a   :  { %4625 = vtanh.f32 %v2732_v7  ;;  %v3633_v19 = vmul.f32 -1.442695, %v2732_v7 }
0x2d0c   :  { %4627 = vpow2.f32 %v3633_v19 }
0x2d14   :  { %v4626_v46 = vpop.eup %4625 }
0x2d15   :  { %2742 = vrot.lane.b32.xlu1 %v4626_v46, %s4734_s2 }
0x2d16   :  { %v4628_v28 = vpop.eup %4627 }
0x2d17   :  { %v2736_v54 = vadd.f32 1.0, %v4628_v28 }
0x2d19   :  { %4629 = vrcp.f32 %v2736_v54 }
0x2d23   :  { %v4630_v60 = vpop.eup %4629 }
0x2d24   :  { %v2740_v58 = vmul.f32 %v4630_v60, %v2650_v17 }
0x2d87   :  { %v2743_v29 = vpop.permute.xlu1 %2742 }
0x2d88   :  { %v2745_v30 = vmul.f32 %v4630_v60, %v2743_v29 }
0x2d8a   :  { %2747 = vrot.lane.b32.xlu0 %v2745_v30, %s4735_s6 }
0x2dfc   :  { %v2748_v22 = vpop.permute.xlu0 %2747 }
0x2dfd   :  { %v2750_v33 = vadd.f32 %v2748_v22, %v2740_v58 }
0x2dff   :  { %4631 = vtanh.f32 %v2750_v33 }
0x2e09   :  { %v4632_v32 = vpop.eup %4631 }
0x2e0a   :  { %2753 = vrot.lane.b32.xlu1 %v4632_v32, %s4734_s2 }
0x2e7c   :  { %v2754_v34 = vpop.permute.xlu1 %2753 }
0x2e7d   :  { %v2756_v63 = vmul.f32 %v4630_v60, %v2754_v34 }
0x2e7f   :  { %2758 = vrot.lane.b32.xlu0 %v2756_v63, %s4735_s6 }
0x2ef1   :  { %v2759_v38 = vpop.permute.xlu0 %2758 }
0x2ef2   :  { %4178 = vmatmul.mubr.msk.f32.vlgmr.msra.gmra.mrb[42].mxu1 %vm370_vm2, %v2759_v38 }
0x2ef3   :  { %4417 = vmatpush3.bf16.msra.mxu1 %v5376_v25  ;;  %4199 = vmatprep.mubr.msk.f32.mxu1 %vm4732_vm1, %v4733_v14 }
0x2ef4   :  { %4418 = vmatprep.subr.bf16.mxu1 %v4731_v8 }
0x2ef7   :  { %4420 = vmatpush3.bf16.msra.mxu1 %v5395_v47 }
0x2ef8   :  { %4427 = vmatprep.subr.bf16.mxu1 %v4731_v8 }
0x2fc5   :  { %v2828_v43 = vpop.f32.mrb[42].mxu1 }
0x2fc6   :  { %v2832_v10 = vadd.f32 %v5438_v31, %v2828_v43  ;;  %v4179_v35 = vpop.f32.mrb[43].mxu1 }
0x2fc8   :  { %4633 = vtanh.f32 %v2832_v10  ;;  %v3635_v4 = vmul.f32 -1.442695, %v2832_v10 }
0x2fca   :  { %4635 = vpow2.f32 %v3635_v4 }
0x2fd2   :  { %v4634_v37 = vpop.eup %4633 }
0x2fd3   :  { %2842 = vrot.lane.b32.xlu1 %v4634_v37, %s4734_s2 }
0x2fd4   :  { %v4636_v39 = vpop.eup %4635 }
0x2fd5   :  { %v2836_v3 = vadd.f32 1.0, %v4636_v39 }
0x2fd7   :  { %4637 = vrcp.f32 %v2836_v3  ;;  %v3261_v3 = vld [vmem:[%s5605_s13] sm:$0xff] }
0x2fe1   :  { %v4638_v21 = vpop.eup %4637 }
0x2fe2   :  { %v2840_v40 = vmul.f32 %v4638_v21, %v2750_v33 }
0x3045   :  { %v2843_v55 = vpop.permute.xlu1 %2842 }
0x3046   :  { %v2845_v6 = vmul.f32 %v4638_v21, %v2843_v55 }
0x3048   :  { %2847 = vrot.lane.b32.xlu0 %v2845_v6, %s4735_s6  ;;  %v3263_v6 = vld [vmem:[%s5605_s13 + $0x10] sm:$0xff] }
0x30ba   :  { %v2848_v51 = vpop.permute.xlu0 %2847 }
0x30bb   :  { %v2850_v41 = vadd.f32 %v2848_v51, %v2840_v40  ;;  %v3264_v40 = vld [vmem:[%s5605_s13 + $0x18] sm:$0xff] }
0x30bd   :  { %4639 = vtanh.f32 %v2850_v41 }
0x30c7   :  { %v4640_v31 = vpop.eup %4639 }
0x30c8   :  { %2853 = vrot.lane.b32.xlu1 %v4640_v31, %s4734_s2  ;;  %v3644_v31 = vld [vmem:[%s5622_s23 + $0x18] sm:$0xff] }
0x313a   :  { %v2854_v42 = vpop.permute.xlu1 %2853 }
0x313b   :  { %v2856_v44 = vmul.f32 %v4638_v21, %v2854_v42  ;;  %v3262_v21 = vld [vmem:[%s5605_s13 + $0x8] sm:$0xff] }
0x313c   :  { %v4434_v55 = vpack.c.bf16 %v3262_v21, %v3261_v3 }
0x313d   :  { %2858 = vrot.lane.b32.xlu0 %v2856_v44, %s4735_s6 }
0x31af   :  { %v2859_v11 = vpop.permute.xlu0 %2858 }
0x31b0   :  { %4189 = vmatmul.mubr.msk.f32.vlgmr.msra.gmra.mrb[34].mxu0 %vm370_vm2, %v2859_v11 }
0x31b1   :  { %4423 = vmatpush3.bf16.msra.mxu0 %v5376_v25  ;;  %4210 = vmatprep.mubr.msk.f32.mxu0 %vm4732_vm1, %v4733_v14 }
0x31b2   :  { %4424 = vmatprep.subr.bf16.mxu0 %v4731_v8 }
0x31b5   :  { %4426 = vmatpush3.bf16.msra.mxu0 %v5395_v47 }
0x31b6   :  { %4439 = vmatprep.subr.bf16.mxu0 %v4731_v8 }
0x3283   :  { %v2928_v48 = vpop.f32.mrb[34].mxu0 }
0x3284   :  { %v2932_v50 = vadd.f32 %v5444_v26, %v2928_v48  ;;  %v4190_v56 = vpop.f32.mrb[35].mxu0  ;;  %v3617_v48 = vld [vmem:[#allocation2] ss:$0 sm:$0xff] }
0x3286   :  { %4641 = vtanh.f32 %v2932_v50  ;;  %v3637_v1 = vmul.f32 -1.442695, %v2932_v50 }
0x3288   :  { %4643 = vpow2.f32 %v3637_v1 }
0x3290   :  { %v4642_v61 = vpop.eup %4641 }
0x3291   :  { %2942 = vrot.lane.b32.xlu1 %v4642_v61, %s4734_s2 }
0x3292   :  { %v4644_v2 = vpop.eup %4643 }
0x3293   :  { %v2936_v59 = vadd.f32 1.0, %v4644_v2 }
0x3295   :  { %4645 = vrcp.f32 %v2936_v59  ;;  %v3645_v59 = vld [vmem:[%s5623_s3 + $0x18] sm:$0xff] }
0x329f   :  { %v4646_v18 = vpop.eup %4645 }
0x32a0   :  { %v2940_v12 = vmul.f32 %v4646_v18, %v2850_v41  ;;  %v4437_v41 = vpack.c.bf16 %v3264_v40, %v3263_v6 }
0x3303   :  { %v2943_v5 = vpop.permute.xlu1 %2942 }
0x3304   :  { %v2945_v9 = vmul.f32 %v4646_v18, %v2943_v5 }
0x3306   :  { %2947 = vrot.lane.b32.xlu0 %v2945_v9, %s4735_s6 }
0x3378   :  { %v2948_v13 = vpop.permute.xlu0 %2947 }
0x3379   :  { %v2950_v15 = vadd.f32 %v2948_v13, %v2940_v12 }
0x337b   :  { %4647 = vtanh.f32 %v2950_v15 }
0x3385   :  { %v4648_v26 = vpop.eup %4647 }
0x3386   :  { %2953 = vrot.lane.b32.xlu1 %v4648_v26, %s4734_s2 }
0x33f8   :  { %v2954_v20 = vpop.permute.xlu1 %2953 }
0x33f9   :  { %v2956_v45 = vmul.f32 %v4646_v18, %v2954_v20 }
0x33fb   :  { %2958 = vrot.lane.b32.xlu0 %v2956_v45, %s4735_s6 }
0x346d   :  { %v2959_v49 = vpop.permute.xlu0 %2958 }
0x346e   :  { %4200 = vmatmul.mubr.msk.f32.vlgmr.msra.gmra.mrb[44].mxu1 %vm370_vm2, %v2959_v49 }
0x346f   :  { %4429 = vmatpush3.bf16.msra.mxu1 %v5376_v25  ;;  %4221 = vmatprep.mubr.msk.f32.mxu1 %vm4732_vm1, %v4733_v14 }
0x3470   :  { %4430 = vmatprep.subr.bf16.mxu1 %v4731_v8 }
0x3473   :  { %4432 = vmatpush3.bf16.msra.mxu1 %v5395_v47 }
0x3474   :  { %4433 = vmatprep.subr.bf16.mxu1 %v4731_v8 }
0x3541   :  { %v3028_v16 = vpop.f32.mrb[44].mxu1 }
0x3542   :  { %v3032_v17 = vadd.f32 %v5442_v0, %v3028_v16  ;;  %v4201_v62 = vpop.f32.mrb[45].mxu1 }
0x3544   :  { %4649 = vtanh.f32 %v3032_v17  ;;  %v3639_v24 = vmul.f32 -1.442695, %v3032_v17 }
0x3546   :  { %4651 = vpow2.f32 %v3639_v24 }
0x354e   :  { %v4650_v23 = vpop.eup %4649 }
0x354f   :  { %3042 = vrot.lane.b32.xlu1 %v4650_v23, %s4734_s2 }
0x3550   :  { %v4652_v25 = vpop.eup %4651 }
0x3551   :  { %v3036_v27 = vadd.f32 1.0, %v4652_v25 }
0x3553   :  { %4653 = vrcp.f32 %v3036_v27 }
0x355d   :  { %v4654_v53 = vpop.eup %4653 }
0x355e   :  { %v3040_v47 = vmul.f32 %v4654_v53, %v2950_v15 }
0x35c1   :  { %v3043_v7 = vpop.permute.xlu1 %3042 }
0x35c2   :  { %v3045_v52 = vmul.f32 %v4654_v53, %v3043_v7  ;;  %v3371_v7 = vld [vmem:[%s5624_s17] sm:$0xff] }
0x35c4   :  { %3047 = vrot.lane.b32.xlu0 %v3045_v52, %s4735_s6  ;;  %v3372_v52 = vld [vmem:[%s5624_s17 + $0x8] sm:$0xff] }
0x3636   :  { %v3048_v46 = vpop.permute.xlu0 %3047 }
0x3637   :  { %v3050_v19 = vadd.f32 %v3048_v46, %v3040_v47  ;;  %v4440_v47 = vpack.c.bf16 %v3372_v52, %v3371_v7 }
0x3639   :  { %4655 = vtanh.f32 %v3050_v19 }
0x3643   :  { %v4656_v0 = vpop.eup %4655 }
0x3644   :  { %3053 = vrot.lane.b32.xlu1 %v4656_v0, %s4734_s2  ;;  %v3373_v0 = vld [vmem:[%s5624_s17 + $0x10] sm:$0xff] }
0x36b6   :  { %v3054_v28 = vpop.permute.xlu1 %3053 }
0x36b7   :  { %v3056_v54 = vmul.f32 %v4654_v53, %v3054_v28  ;;  %v3374_v28 = vld [vmem:[%s5624_s17 + $0x18] sm:$0xff] }
0x36b9   :  { %3058 = vrot.lane.b32.xlu0 %v3056_v54, %s4735_s6  ;;  %v4443_v54 = vpack.c.bf16 %v3374_v28, %v3373_v0 }
0x372b   :  { %v3059_v60 = vpop.permute.xlu0 %3058 }
0x372c   :  { %4211 = vmatmul.mubr.msk.f32.vlgmr.msra.gmra.mrb[36].mxu0 %vm370_vm2, %v3059_v60 }
0x372d   :  { %4243 = vmatprep.mubr.msk.f32.mxu0 %vm4732_vm1, %v4733_v14  ;;  %4441 = vmatpush3.bf16.msra.mxu0 %v4440_v47 }
0x372e   :  { %4442 = vmatprep.subr.bf16.mxu0 %v4731_v8 }
0x3731   :  { %4444 = vmatpush3.bf16.msra.mxu0 %v4443_v54 }
0x3732   :  { %4445 = vmatprep.subr.bf16.mxu0 %v4731_v8 }
0x37ff   :  { %v3128_v29 = vpop.f32.mrb[36].mxu0 }
0x3800   :  { %v3132_v30 = vadd.f32 %v5448_v57, %v3128_v29  ;;  %v4212_v58 = vpop.f32.mrb[37].mxu0 }
0x3802   :  { %4657 = vtanh.f32 %v3132_v30  ;;  %v3641_v33 = vmul.f32 -1.442695, %v3132_v30 }
0x3804   :  { %4659 = vpow2.f32 %v3641_v33  ;;  %v3368_v33 = vld [vmem:[%s5625_s21 + $0x8] sm:$0xff] }
0x380c   :  { %v4658_v22 = vpop.eup %4657 }
0x380d   :  { %3142 = vrot.lane.b32.xlu1 %v4658_v22, %s4734_s2  ;;  %v3367_v22 = vld [vmem:[%s5625_s21] sm:$0xff] }
0x380e   :  { %v4660_v32 = vpop.eup %4659 }
0x380f   :  { %v3136_v34 = vadd.f32 1.0, %v4660_v32  ;;  %v4446_v32 = vpack.c.bf16 %v3368_v33, %v3367_v22 }
0x3811   :  { %4661 = vrcp.f32 %v3136_v34  ;;  %v3369_v34 = vld [vmem:[%s5625_s21 + $0x10] sm:$0xff] }
0x381b   :  { %v4662_v63 = vpop.eup %4661 }
0x381c   :  { %v3140_v10 = vmul.f32 %v4662_v63, %v3050_v19 }
0x387f   :  { %v3143_v38 = vpop.permute.xlu1 %3142 }
0x3880   :  { %v3145_v43 = vmul.f32 %v4662_v63, %v3143_v38 }
0x3882   :  { %3147 = vrot.lane.b32.xlu0 %v3145_v43, %s4735_s6 }
0x38f4   :  { %v3148_v35 = vpop.permute.xlu0 %3147 }
0x38f5   :  { %v3150_v37 = vadd.f32 %v3148_v35, %v3140_v10 }
0x38f7   :  { %4663 = vtanh.f32 %v3150_v37 }
0x3901   :  { %v4664_v57 = vpop.eup %4663 }
0x3902   :  { %3153 = vrot.lane.b32.xlu1 %v4664_v57, %s4734_s2 }
0x3974   :  { %v3154_v4 = vpop.permute.xlu1 %3153 }
0x3975   :  { %v3156_v39 = vmul.f32 %v4662_v63, %v3154_v4  ;;  %v3370_v63 = vld [vmem:[%s5625_s21 + $0x18] sm:$0xff]  ;;  %v3650_v4 = vld [vmem:[%s5626_s25] ss:$0 sm:$0xff] }
0x3976   :  { %v4449_v43 = vpack.c.bf16 %v3370_v63, %v3369_v34 }
0x3977   :  { %3158 = vrot.lane.b32.xlu0 %v3156_v39, %s4735_s6 }
0x39e9   :  { %v3159_v51 = vpop.permute.xlu0 %3158 }
0x39ea   :  { %4222 = vmatmul.mubr.msk.f32.vlgmr.msra.gmra.mrb[46].mxu1 %vm370_vm2, %v3159_v51 }
0x39eb   :  { %4435 = vmatpush3.bf16.msra.mxu1 %v4434_v55  ;;  %4232 = vmatprep.mubr.msk.f32.mxu1 %vm4732_vm1, %v4733_v14 }
0x39ec   :  { %4436 = vmatprep.subr.bf16.mxu1 %v4731_v8 }
0x39ef   :  { %4438 = vmatpush3.bf16.msra.mxu1 %v4437_v41 }
0x39f2   :  { %4233 = vmatmul.mubr.msk.f32.vlgmr.msra.gmra.mrb[32].mxu1 %vm370_vm2, %v3644_v31 }
0x3abd   :  { %v3228_v42 = vpop.f32.mrb[46].mxu1 }
0x3abe   :  { %v3232_v44 = vadd.f32 %v5446_v36, %v3228_v42  ;;  %v4223_v11 = vpop.f32.mrb[47].mxu1 }
0x3ac0   :  { %4665 = vtanh.f32 %v3232_v44  ;;  %v3643_v36 = vmul.f32 -1.442695, %v3232_v44 }
0x3ac5   :  { %v3334_v50 = vpop.f32.mrb[32].mxu1 }
0x3ac6   :  { %v4461_v56 = vadd.f32 %v3617_v48, %v3334_v50  ;;  %v4234_v61 = vpop.f32.mrb[33].mxu1 }
0x3ac8   :  { %4667 = vtanh.f32 %v4461_v56  ;;  %v3647_v18 = vmul.f32 -1.442695, %v4461_v56 }
0x3ac9   :  { %4669 = vpow2.f32 %v3643_v36 }
0x3aca   :  { %v4666_v1 = vpop.eup %4665  ;;  %4671 = vpow2.f32 %v3647_v18 }
0x3acb   :  { %3242 = vrot.lane.b32.xlu0 %v4666_v1, %s4734_s2 }
0x3ad2   :  { %v4668_v2 = vpop.eup %4667 }
0x3ad3   :  { %3352 = vrot.lane.b32.xlu1 %v4668_v2, %s4734_s2  ;;  %v4670_v5 = vpop.eup %4669 }
0x3ad4   :  { %v3236_v9 = vadd.f32 1.0, %v4670_v5  ;;  %v4672_v12 = vpop.eup %4671 }
0x3ad5   :  { %v3342_v13 = vadd.f32 1.0, %v4672_v12 }
0x3ad6   :  { %4673 = vrcp.f32 %v3236_v9 }
0x3ad7   :  { %3347 = vrot.lane.b32.xlu1 %v3645_v59, %s4735_s6  ;;  %4675 = vrcp.f32 %v3342_v13 }
0x3ae0   :  { %v4674_v15 = vpop.eup %4673 }
0x3ae1   :  { %v4676_v45 = vpop.eup %4675  ;;  %v3240_v62 = vmul.f32 %v4674_v15, %v3150_v37 }
0x3b3d   :  { %v3243_v26 = vpop.permute.xlu0 %3242 }
0x3b3e   :  { %v3245_v20 = vmul.f32 %v4674_v15, %v3243_v26 }
0x3b40   :  { %3247 = vrot.lane.b32.xlu1 %v3245_v20, %s4735_s6 }
0x3b45   :  { %v3353_v49 = vpop.permute.xlu1 %3352 }
0x3b46   :  { %v3355_v16 = vmul.f32 %v4676_v45, %v3353_v49 }
0x3b48   :  { %3357 = vrot.lane.b32.xlu0 %v3355_v16, %s4735_s6 }
0x3b49   :  { %v3348_v17 = vpop.permute.xlu1 %3347 }
0x3b4a   :  { %v3350_v25 = vmul.f32 %v4676_v45, %v3348_v17 }
0x3bb2   :  { %v3248_v23 = vpop.permute.xlu1 %3247 }
0x3bb3   :  { %v3250_v24 = vadd.f32 %v3248_v23, %v3240_v62 }
0x3bb5   :  { %4677 = vtanh.f32 %v3250_v24 }
0x3bba   :  { %v3358_v27 = vpop.permute.xlu0 %3357 }
0x3bbb   :  { %v3360_v53 = vadd.f32 %v3358_v27, %v3350_v25 }
0x3bbd   :  { %4679 = vtanh.f32 %v3360_v53 }
0x3bbf   :  { %v4678_v46 = vpop.eup %4677 }
0x3bc0   :  { %3253 = vrot.lane.b32.xlu1 %v4678_v46, %s4734_s2 }
0x3bc7   :  { %v4680_v19 = vpop.eup %4679 }
0x3bc8   :  { %3363 = vrot.lane.b32.xlu0 %v4680_v19, %s4734_s2 }
0x3c32   :  { %v3254_v60 = vpop.permute.xlu1 %3253 }
0x3c33   :  { %v3256_v29 = vmul.f32 %v4674_v15, %v3254_v60 }
0x3c35   :  { %3451 = vrot.lane.b32.xlu1 %v3256_v29, %s4735_s6 }
0x3c3a   :  { %v3364_v30 = vpop.permute.xlu0 %3363 }
0x3c3b   :  { %v3366_v58 = vmul.f32 %v4676_v45, %v3364_v30 }
0x3c3d   :  { %3376 = vrot.lane.b32.xlu0 %v3366_v58, %s4735_s6 }
0x3ca7   :  { %v3452_v10 = vpop.permute.xlu1 %3451 }
0x3caf   :  { %v3377_v38 = vpop.permute.xlu0 %3376 }
0x3cb0   :  { %4244 = vmatmul.mubr.msk.f32.vlgmr.msra.gmra.mrb[38].mxu0 %vm370_vm2, %v3377_v38 }
0x3cb1   :  { %4447 = vmatpush3.bf16.msra.mxu0 %v4446_v32  ;;  %4254 = vmatprep.mubr.msk.f32.mxu0 %vm4732_vm1, %v4733_v14 }
0x3cb2   :  { %4448 = vmatprep.subr.bf16.mxu0 %v4731_v8 }
0x3cb5   :  { %4450 = vmatpush3.bf16.msra.mxu0 %v4449_v43 }
0x3cb8   :  { %4255 = vmatmul.mubr.msk.f32.vlgmr.msra.gmra.mrb[40].mxu0 %vm370_vm2, %v3452_v10 }
0x3d83   :  { %v3446_v35 = vpop.f32.mrb[38].mxu0 }
0x3d84   :  { %v4245_v37 = vpop.f32.mrb[39].mxu0 }
0x3d8b   :  { %v3521_v57 = vpop.f32.mrb[40].mxu0 }
0x3d8c   :  { %v3522_v39 = vadd.f32 %v3521_v57, %v3446_v35  ;;  %v4256_v3 = vpop.f32.mrb[41].mxu0 }
0x3d8e   :  { %v3532_v21 = vadd.f32 %v3650_v4, %v3522_v39 }
0x3d90   :  { %3533 = vst.msk [vmem:[%s5612_s20] sm:$0xff] %vm99_vm0, %v3532_v21 }
0x3d91   :  { %3538 = vsyncpa [#allocation3], 1 }
0x3d92   :  { %3539 = vsyncpa [#allocation5], 1 }

</bundles_post_ra>
